<compile_context>
chip_gen: v7x
topology: tpu7x:2x2x1
jax: 0.10.0
libtpu: 0.0.40
codegen_flags: <defaults>
</compile_context>

<pallas_src>
import math

import jax
import jax.numpy as jnp
from jax.experimental import pallas as pl
from jax.experimental.pallas import tpu as pltpu

INV_SQRT2 = 1.0 / math.sqrt(2.0)
_MiB = 1024 * 1024


def _gelu_exact(x):
    # Exact erf-based GELU (f32), matching the PyTorch reference implementation.
    return x * 0.5 * (1.0 + jax.lax.erf(x * INV_SQRT2))


def imgnn_kernel(x_ref, w1_ref, b1_ref, w2_ref, b2_ref, o_ref):
    # denseL1 (MXU, f32 accumulate) + bias + exact GELU, all fused in VMEM.
    h = jnp.dot(x_ref[...], w1_ref[...], preferred_element_type=jnp.float32)
    h = _gelu_exact(h + b1_ref[...])
    # denseL2 (cast the activation back to the MXU operand dtype).
    out = jnp.dot(h.astype(w2_ref.dtype), w2_ref[...],
                  preferred_element_type=jnp.float32)
    out = out + b2_ref[...]
    # TODO(synk): dropout is identity at inference; training-mode dropout would use
    # pltpu.prng_seed / pltpu.stateful_bernoulli.
    o_ref[...] = out.astype(o_ref.dtype)


def _vmem_capacity_bytes():
    try:
        return int(pltpu.get_tpu_info().vmem_capacity_bytes)
    except Exception:
        return 64 * _MiB  # conservative default (v7x per-TC VMEM)


def _tile_vmem_bytes(bm, input_dim, mid, out_dim, op_bytes):
    # Double-buffered x tile + double-buffered output tile + resident weights and
    # biases + in-kernel intermediates (h in f32 and compute dtype, f32 out).
    x_bytes = 2 * bm * input_dim * op_bytes
    o_bytes = 2 * bm * out_dim * 4
    w_bytes = (input_dim * mid + mid * out_dim) * op_bytes
    b_bytes = (mid + out_dim) * 4
    inter = bm * mid * (4 + op_bytes) + bm * out_dim * 4
    return x_bytes + o_bytes + w_bytes + b_bytes + inter


def _pick_bm(B, input_dim, mid, out_dim, op_bytes, budget_bytes):
    assert B % 8 == 0, "batch must be a multiple of 8"
    candidates = [512, 256, 128, 64, 32, 16, 8]
    fitting = [c for c in candidates
               if B % c == 0
               and _tile_vmem_bytes(c, input_dim, mid, out_dim, op_bytes) <= budget_bytes]
    if not fitting:
        return 8
    # Prefer >= 2 grid steps so Mosaic can shard across v7x's two TensorCores.
    multi = [c for c in fitting if B // c >= 2]
    return (multi or fitting)[0]


def imgnn_forward(x, w1_t, b1, w2_t, b2, *, bm=None,
                  compute_dtype=jnp.bfloat16, single_buffer_weights=True):
    """x: (B, input_dim). w1_t: (input_dim, mid). w2_t: (mid, out_dim).
    b1: (mid,), b2: (out_dim,). Output dtype follows x."""
    B, input_dim = x.shape
    mid = w1_t.shape[1]
    out_dim = w2_t.shape[1]

    op_bytes = jnp.dtype(compute_dtype).itemsize
    vmem_cap = _vmem_capacity_bytes()
    budget = int(0.55 * min(vmem_cap, 128 * _MiB))
    if bm is None:
        bm = _pick_bm(B, input_dim, mid, out_dim, op_bytes, budget)
    assert B % bm == 0, "batch tile must divide batch"

    x_c = x.astype(compute_dtype)
    w1_c = w1_t.astype(compute_dtype)
    w2_c = w2_t.astype(compute_dtype)
    b1_r = b1.reshape(1, mid).astype(jnp.float32)
    b2_r = b2.reshape(1, out_dim).astype(jnp.float32)

    grid = (B // bm,)
    # Raise the scoped VMEM limit (v5e default is only 16 MiB) but stay well under
    # the physical per-core capacity (64 MiB on v7x, 128 MiB on v5e/v6e).
    vmem_limit = min(int(0.75 * vmem_cap), 96 * _MiB)

    def _build(single_buf):
        def _const_spec(shape):
            # Grid-invariant operand: single-buffer it to save VMEM when supported.
            if single_buf:
                return pl.BlockSpec(shape, lambda i: (0, 0),
                                    pipeline_mode=pl.Buffered(1))
            return pl.BlockSpec(shape, lambda i: (0, 0))

        return pl.pallas_call(
            imgnn_kernel,
            out_shape=jax.ShapeDtypeStruct((B, out_dim), x.dtype),
            grid=grid,
            in_specs=[
                pl.BlockSpec((bm, input_dim), lambda i: (i, 0)),  # x tile (pipelined)
                _const_spec((input_dim, mid)),                    # W1^T (resident)
                _const_spec((1, mid)),                            # b1
                _const_spec((mid, out_dim)),                      # W2^T (resident)
                _const_spec((1, out_dim)),                        # b2
            ],
            out_specs=pl.BlockSpec((bm, out_dim), lambda i: (i, 0)),
            compiler_params=pltpu.CompilerParams(
                dimension_semantics=("parallel",),
                vmem_limit_bytes=vmem_limit),
        )

    try:
        return _build(single_buffer_weights)(x_c, w1_c, b1_r, w2_c, b2_r)
    except Exception:
        if not single_buffer_weights:
            raise
        # Fallback: default (double) buffering for the grid-invariant operands.
        return _build(False)(x_c, w1_c, b1_r, w2_c, b2_r)


if __name__ == "__main__":
    # Small shapes consistent with the module (scaled down from 2048/512/128).
    B, input_dim, mid_dim, out_dim = 128, 256, 128, 128

    key = jax.random.PRNGKey(0)
    kx, kw1, kb1, kw2, kb2 = jax.random.split(key, 5)

    x = jax.random.normal(kx, (B, input_dim), dtype=jnp.float32)

    # PyTorch Linear stores (out, in); the kernel takes the transposed (in, out).
    w1 = jax.random.normal(kw1, (mid_dim, input_dim), dtype=jnp.float32) * 0.02
    b1 = jax.random.normal(kb1, (mid_dim,), dtype=jnp.float32) * 0.02
    w2 = jax.random.normal(kw2, (out_dim, mid_dim), dtype=jnp.float32) * 0.02
    b2 = jax.random.normal(kb2, (out_dim,), dtype=jnp.float32) * 0.02

    w1_t = w1.T                      # (input_dim, mid_dim)
    w2_t = w2.T                      # (mid_dim, out_dim)

    # Reference (plain JAX, f32, erf GELU) -- same math as the PyTorch forward (eval).
    h_ref = x @ w1_t + b1
    h_ref = h_ref * 0.5 * (1.0 + jax.lax.erf(h_ref * INV_SQRT2))
    ref = h_ref @ w2_t + b2

    # 1) Exact-semantics check: f32 compute path, tight tolerance.
    out_f32 = jax.block_until_ready(
        imgnn_forward(x, w1_t, b1, w2_t, b2, compute_dtype=jnp.float32))
    assert jnp.allclose(out_f32, ref, atol=1e-5, rtol=1e-5), "f32 path mismatch"

    # 2) Performance path: bf16 MXU operands, f32 accumulation (looser tolerance).
    out_bf16 = jax.block_until_ready(
        imgnn_forward(x, w1_t, b1, w2_t, b2, compute_dtype=jnp.bfloat16))
    assert jnp.allclose(out_bf16, ref, atol=2e-2, rtol=2e-2), "bf16 path mismatch"

    print("KERNEL_OK")
</pallas_src>

<mosaic_0001>
module attributes {stable_mosaic.version = 11 : i64} {
  func.func @imgnn_kernel(%arg0: i32, %arg1: memref<64x256xf32, #tpu.memory_space<vmem>>, %arg2: memref<256x128xf32, #tpu.memory_space<vmem>>, %arg3: memref<1x128xf32, #tpu.memory_space<vmem>>, %arg4: memref<128x128xf32, #tpu.memory_space<vmem>>, %arg5: memref<1x128xf32, #tpu.memory_space<vmem>>, %arg6: memref<64x128xf32, #tpu.memory_space<vmem>>) attributes {dimension_semantics = [#tpu.dimension_semantics<parallel>], iteration_bounds = array<i64: 2>, scalar_prefetch = 0 : i64, scratch_operands = 0 : i64, tpu.core_type = #tpu.core_type<tc>, window_params = [{transform_indices = @transform_0, window_bounds = array<i64: 64, 256>}, {pipeline_mode = #tpu.pipeline_mode<synchronous>, transform_indices = @transform_1, window_bounds = array<i64: 256, 128>}, {pipeline_mode = #tpu.pipeline_mode<synchronous>, transform_indices = @transform_2, window_bounds = array<i64: 1, 128>}, {pipeline_mode = #tpu.pipeline_mode<synchronous>, transform_indices = @transform_3, window_bounds = array<i64: 128, 128>}, {pipeline_mode = #tpu.pipeline_mode<synchronous>, transform_indices = @transform_4, window_bounds = array<i64: 1, 128>}, {transform_indices = @transform_5, window_bounds = array<i64: 64, 128>}]} {
    %c0 = arith.constant 0 : index
    %c0_0 = arith.constant 0 : index
    %0 = vector.load %arg1[%c0, %c0_0] : memref<64x256xf32, #tpu.memory_space<vmem>>, vector<64x256xf32>
    %c0_1 = arith.constant 0 : index
    %c0_2 = arith.constant 0 : index
    %1 = vector.load %arg2[%c0_1, %c0_2] : memref<256x128xf32, #tpu.memory_space<vmem>>, vector<256x128xf32>
    %cst = arith.constant dense<0.000000e+00> : vector<64x128xf32>
    %2 = tpu.matmul %0, %1, %cst {dimension_numbers = #tpu.dot_dimension_numbers<[1], [0], [0], [1], [0, 0, 1, 1], [], []>} : vector<64x256xf32>, vector<256x128xf32>, vector<64x128xf32> -> vector<64x128xf32>
    %c0_3 = arith.constant 0 : index
    %c0_4 = arith.constant 0 : index
    %3 = vector.load %arg3[%c0_3, %c0_4] : memref<1x128xf32, #tpu.memory_space<vmem>>, vector<1x128xf32>
    %4 = vector.broadcast %3 : vector<1x128xf32> to vector<64x128xf32>
    %5 = arith.addf %2, %4 : vector<64x128xf32>
    %cst_5 = arith.constant 5.000000e-01 : f32
    %6 = vector.broadcast %cst_5 : f32 to vector<64x128xf32>
    %7 = arith.mulf %5, %6 : vector<64x128xf32>
    %cst_6 = arith.constant 0.707106769 : f32
    %8 = vector.broadcast %cst_6 : f32 to vector<64x128xf32>
    %9 = arith.mulf %5, %8 : vector<64x128xf32>
    %10 = math.erf %9 : vector<64x128xf32>
    %cst_7 = arith.constant 1.000000e+00 : f32
    %11 = vector.broadcast %cst_7 : f32 to vector<64x128xf32>
    %12 = arith.addf %11, %10 : vector<64x128xf32>
    %13 = arith.mulf %7, %12 : vector<64x128xf32>
    %c0_8 = arith.constant 0 : index
    %c0_9 = arith.constant 0 : index
    %14 = vector.load %arg4[%c0_8, %c0_9] : memref<128x128xf32, #tpu.memory_space<vmem>>, vector<128x128xf32>
    %cst_10 = arith.constant dense<0.000000e+00> : vector<64x128xf32>
    %15 = tpu.matmul %13, %14, %cst_10 {dimension_numbers = #tpu.dot_dimension_numbers<[1], [0], [0], [1], [0, 0, 1, 1], [], []>} : vector<64x128xf32>, vector<128x128xf32>, vector<64x128xf32> -> vector<64x128xf32>
    %c0_11 = arith.constant 0 : index
    %c0_12 = arith.constant 0 : index
    %16 = vector.load %arg5[%c0_11, %c0_12] : memref<1x128xf32, #tpu.memory_space<vmem>>, vector<1x128xf32>
    %17 = vector.broadcast %16 : vector<1x128xf32> to vector<64x128xf32>
    %18 = arith.addf %15, %17 : vector<64x128xf32>
    %c0_13 = arith.constant 0 : index
    %c0_14 = arith.constant 0 : index
    %19 = vector.load %arg6[%c0_13, %c0_14] : memref<64x128xf32, #tpu.memory_space<vmem>>, vector<64x128xf32>
    tpu.vector_store %arg6[%c0_13, %c0_14], %18 {strides = array<i32>} : memref<64x128xf32, #tpu.memory_space<vmem>>, vector<64x128xf32>,
    return
  }
  func.func @transform_0(%arg0: i32) -> (i32, i32) {
    %c0_i32 = arith.constant 0 : i32
    %c0_i32_0 = arith.constant 0 : i32
    return %arg0, %c0_i32 : i32, i32
  }
  func.func @transform_1(%arg0: i32) -> (i32, i32) {
    %c0_i32 = arith.constant 0 : i32
    %c0_i32_0 = arith.constant 0 : i32
    %c0_i32_1 = arith.constant 0 : i32
    return %c0_i32, %c0_i32_0 : i32, i32
  }
  func.func @transform_2(%arg0: i32) -> (i32, i32) {
    %c0_i32 = arith.constant 0 : i32
    %c0_i32_0 = arith.constant 0 : i32
    %c0_i32_1 = arith.constant 0 : i32
    return %c0_i32, %c0_i32_0 : i32, i32
  }
  func.func @transform_3(%arg0: i32) -> (i32, i32) {
    %c0_i32 = arith.constant 0 : i32
    %c0_i32_0 = arith.constant 0 : i32
    %c0_i32_1 = arith.constant 0 : i32
    return %c0_i32, %c0_i32_0 : i32, i32
  }
  func.func @transform_4(%arg0: i32) -> (i32, i32) {
    %c0_i32 = arith.constant 0 : i32
    %c0_i32_0 = arith.constant 0 : i32
    %c0_i32_1 = arith.constant 0 : i32
    return %c0_i32, %c0_i32_0 : i32, i32
  }
  func.func @transform_5(%arg0: i32) -> (i32, i32) {
    %c0_i32 = arith.constant 0 : i32
    %c0_i32_0 = arith.constant 0 : i32
    return %arg0, %c0_i32 : i32, i32
  }
}

module attributes {stable_mosaic.version = 11 : i64} {
  func.func @imgnn_kernel(%arg0: i32, %arg1: memref<64x256xf32, #tpu.memory_space<vmem>>, %arg2: memref<256x128xf32, #tpu.memory_space<vmem>>, %arg3: memref<1x128xf32, #tpu.memory_space<vmem>>, %arg4: memref<128x128xf32, #tpu.memory_space<vmem>>, %arg5: memref<1x128xf32, #tpu.memory_space<vmem>>, %arg6: memref<64x128xf32, #tpu.memory_space<vmem>>) attributes {dimension_semantics = [#tpu.dimension_semantics<parallel>], iteration_bounds = array<i64: 2>, scalar_prefetch = 0 : i64, scratch_operands = 0 : i64, tpu.core_type = #tpu.core_type<tc>, window_params = [{transform_indices = @transform_0, window_bounds = array<i64: 64, 256>}, {pipeline_mode = #tpu.pipeline_mode<synchronous>, transform_indices = @transform_1, window_bounds = array<i64: 256, 128>}, {pipeline_mode = #tpu.pipeline_mode<synchronous>, transform_indices = @transform_2, window_bounds = array<i64: 1, 128>}, {pipeline_mode = #tpu.pipeline_mode<synchronous>, transform_indices = @transform_3, window_bounds = array<i64: 128, 128>}, {pipeline_mode = #tpu.pipeline_mode<synchronous>, transform_indices = @transform_4, window_bounds = array<i64: 1, 128>}, {transform_indices = @transform_5, window_bounds = array<i64: 64, 128>}]} {
    %c0 = arith.constant 0 : index
    %c0_0 = arith.constant 0 : index
    %0 = vector.load %arg1[%c0, %c0_0] : memref<64x256xf32, #tpu.memory_space<vmem>>, vector<64x256xf32>
    %c0_1 = arith.constant 0 : index
    %c0_2 = arith.constant 0 : index
    %1 = vector.load %arg2[%c0_1, %c0_2] : memref<256x128xf32, #tpu.memory_space<vmem>>, vector<256x128xf32>
    %cst = arith.constant dense<0.000000e+00> : vector<64x128xf32>
    %2 = tpu.matmul %0, %1, %cst {dimension_numbers = #tpu.dot_dimension_numbers<[1], [0], [0], [1], [0, 0, 1, 1], [], []>} : vector<64x256xf32>, vector<256x128xf32>, vector<64x128xf32> -> vector<64x128xf32>
    %c0_3 = arith.constant 0 : index
    %c0_4 = arith.constant 0 : index
    %3 = vector.load %arg3[%c0_3, %c0_4] : memref<1x128xf32, #tpu.memory_space<vmem>>, vector<1x128xf32>
    %4 = vector.broadcast %3 : vector<1x128xf32> to vector<64x128xf32>
    %5 = arith.addf %2, %4 : vector<64x128xf32>
    %cst_5 = arith.constant 5.000000e-01 : f32
    %6 = vector.broadcast %cst_5 : f32 to vector<64x128xf32>
    %7 = arith.mulf %5, %6 : vector<64x128xf32>
    %cst_6 = arith.constant 0.707106769 : f32
    %8 = vector.broadcast %cst_6 : f32 to vector<64x128xf32>
    %9 = arith.mulf %5, %8 : vector<64x128xf32>
    %10 = math.erf %9 : vector<64x128xf32>
    %cst_7 = arith.constant 1.000000e+00 : f32
    %11 = vector.broadcast %cst_7 : f32 to vector<64x128xf32>
    %12 = arith.addf %11, %10 : vector<64x128xf32>
    %13 = arith.mulf %7, %12 : vector<64x128xf32>
    %c0_8 = arith.constant 0 : index
    %c0_9 = arith.constant 0 : index
    %14 = vector.load %arg4[%c0_8, %c0_9] : memref<128x128xf32, #tpu.memory_space<vmem>>, vector<128x128xf32>
    %cst_10 = arith.constant dense<0.000000e+00> : vector<64x128xf32>
    %15 = tpu.matmul %13, %14, %cst_10 {dimension_numbers = #tpu.dot_dimension_numbers<[1], [0], [0], [1], [0, 0, 1, 1], [], []>} : vector<64x128xf32>, vector<128x128xf32>, vector<64x128xf32> -> vector<64x128xf32>
    %c0_11 = arith.constant 0 : index
    %c0_12 = arith.constant 0 : index
    %16 = vector.load %arg5[%c0_11, %c0_12] : memref<1x128xf32, #tpu.memory_space<vmem>>, vector<1x128xf32>
    %17 = vector.broadcast %16 : vector<1x128xf32> to vector<64x128xf32>
    %18 = arith.addf %15, %17 : vector<64x128xf32>
    %c0_13 = arith.constant 0 : index
    %c0_14 = arith.constant 0 : index
    %19 = vector.load %arg6[%c0_13, %c0_14] : memref<64x128xf32, #tpu.memory_space<vmem>>, vector<64x128xf32>
    tpu.vector_store %arg6[%c0_13, %c0_14], %18 {strides = array<i32>} : memref<64x128xf32, #tpu.memory_space<vmem>>, vector<64x128xf32>,
    return
  }
  func.func @transform_0(%arg0: i32) -> (i32, i32) {
    %c0_i32 = arith.constant 0 : i32
    %c0_i32_0 = arith.constant 0 : i32
    return %arg0, %c0_i32 : i32, i32
  }
  func.func @transform_1(%arg0: i32) -> (i32, i32) {
    %c0_i32 = arith.constant 0 : i32
    %c0_i32_0 = arith.constant 0 : i32
    %c0_i32_1 = arith.constant 0 : i32
    return %c0_i32, %c0_i32_0 : i32, i32
  }
  func.func @transform_2(%arg0: i32) -> (i32, i32) {
    %c0_i32 = arith.constant 0 : i32
    %c0_i32_0 = arith.constant 0 : i32
    %c0_i32_1 = arith.constant 0 : i32
    return %c0_i32, %c0_i32_0 : i32, i32
  }
  func.func @transform_3(%arg0: i32) -> (i32, i32) {
    %c0_i32 = arith.constant 0 : i32
    %c0_i32_0 = arith.constant 0 : i32
    %c0_i32_1 = arith.constant 0 : i32
    return %c0_i32, %c0_i32_0 : i32, i32
  }
  func.func @transform_4(%arg0: i32) -> (i32, i32) {
    %c0_i32 = arith.constant 0 : i32
    %c0_i32_0 = arith.constant 0 : i32
    %c0_i32_1 = arith.constant 0 : i32
    return %c0_i32, %c0_i32_0 : i32, i32
  }
  func.func @transform_5(%arg0: i32) -> (i32, i32) {
    %c0_i32 = arith.constant 0 : i32
    %c0_i32_0 = arith.constant 0 : i32
    return %arg0, %c0_i32 : i32, i32
  }
}

</mosaic_0001>

<bundles_post_ra>
// kernel: tpu_custom_call.1
= control target key start
LH: loop header
LB: loop body
LE: loop exit
PB: predicated region body
PF: predicated region fallthrough
CT: control target
= control target key end

     0   :  { %10 = vsyncpa [#allocation3], 0  ;;  %s1485_s0 = inlined_call_operand.hbm [shape: f32[128,256], index: 0, kind: input, shape index: {}]   ;;  %s1486_s1 = inlined_call_operand.hbm [shape: f32[256,128], index: 1, kind: input, shape index: {}]   ;;  %s1487_s2 = inlined_call_operand.vmem [shape: f32[1,128], index: 2, kind: input, shape index: {}]   ;;  %s1488_s3 = inlined_call_operand.hbm [shape: f32[128,128], index: 3, kind: input, shape index: {}]   ;;  %s1489_s4 = inlined_call_operand.vmem [shape: f32[1,128], index: 4, kind: input, shape index: {}]   ;;  %s1490_s5 = inlined_call_operand.hbm [shape: f32[128,128], index: 5, kind: output, shape index: {}]  }
   0x1   :  { %12 = vsyncpa [#allocation3 + $0x1], 0 }
   0x2   :  { %13 = vsyncpa [#allocation6], 0 }
   0x3   :  { %14 = vsyncpa [#allocation4], 0 }
   0x4   :  { %16 = vsyncpa [#allocation4 + $0x1], 0  ;;  %s1216_s18 = smov 0   ;;  %s1218_s19 = smov 0  }
   0x5   :  { %s1220_s20 = smov 0   ;;  %s1222_s21 = smov 0  }
   0x6 LB: > { %s1237_s22 = sadd.s32 4294967295, %s1174_s21   ;;  %s717_s23 = sadd.s32 4294967294, %s1174_s21   ;;  %s1174_s21 = sphi %s1222_s21, %s1510_s21   ;;  %s1170_s20 = sphi %s1220_s20, %s1509_s20   ;;  %s1166_s19 = sphi %s1218_s19, %s1508_s19   ;;  %s1162_s18 = sphi %s1216_s18, %s1507_s18  }
   0x7   : > { %p42_p0 = scmp.ne.s32.totalorder %s1166_s19, %s1162_s18  ;;  %p1491_p1 = scmp.eq.s32.totalorder %s1237_s22, 0 }
   0x8   : > { %p156_p3 = scmp.eq.s32.totalorder %s717_s23, 1  ;;  %p718_p5 = scmp.ge.s32.totalorder %s1174_s21, 1 }
   0x9   : > { %p1246_p4 = por %p1491_p1, %p42_p0  ;;  %p163_p7 = scmp.lt.s32.totalorder %s1174_s21, 3 }
   0xa   : > { %p1251_p6 = por %p156_p3, %p42_p0  ;;  %s1176_s27 = smov [#allocation5]  }
   0xb   : > { %s1494_s24 = scalar_select %p1246_p4, 1, 0 }
   0xc   : > { %s1495_s25 = scalar_select %p1251_p6, 1, 0 }
   0xd   : > { %p1256_p8 = pnand %p718_p5, %p163_p7  ;;  %s175_s28 = sshll.u32 %s1176_s27, 4  ;;  %s1260_s28 = int_to_ptr.vmem [resolvable:$true] %s175_s28 }
   0xe   : > { %s1177_s30 = smov [#allocation7]   ;;  %s1018_s9 = scalar_lea.hbm %s1486_s1, 4096 }
   0xf   : > { %p941_p9 = pneg %p1256_p8  ;;  %s191_s6 = sshll.u32 %s1177_s30, 4  ;;  %s1271_s6 = int_to_ptr.vmem [resolvable:$true] %s191_s6 }
  0x10   : > { %p1019_p12 = scmp.ne.s32.totalorder %s1486_s1, %s1018_s9  ;;  %p1025_p5 = scmp.lt.u32.totalorder %s1018_s9, %s1486_s1 }
  0x11   : > { %p1267_p11 = pnand %p941_p9, %p1491_p1 }
  0x13   : > { %p1020_p13 = pneg %p1267_p11 }
  0x15   : > { %p1021_p0 = pnand %p1020_p13, %p1019_p12 }
  0x17   : > { %p1022_p3 = pneg %p1021_p0 }
  0x19   : > { %p1027_p7 = pnand %p1025_p5, %p1022_p3 }
  0x1b   : > { %1030 = shalt.err (!%p1027_p7)
}
  0x1c   : > { %s1031_s14 = scalar_lea.vmem %s1260_s28, 4096  ;;  %p1039_p2 = scmp.lt.s32.totalorder %s1260_s28, %s1260_s28 }
  0x1d   : > { %p1032_p9 = scmp.ne.s32.totalorder %s1260_s28, %s1031_s14  ;;  %p1040_p12 = scmp.lt.s32.totalorder %s1031_s14, %s1031_s14 }
  0x1f   : > { %p1034_p10 = pnand %p1032_p9, %p1020_p13  ;;  %p1041_p0 = por %p1040_p12, %p1039_p2 }
  0x21   : > { %p1035_p1 = pneg %p1034_p10 }
  0x23   : > { %p1042_p6 = pnand %p1041_p0, %p1035_p1 }
  0x25   : > { %1045 = shalt.err (!%p1042_p6)
}
  0x26   : > { %s1178_s15 = smov 128   ;;  %s1179_s16 = smov 8  }
  0x27   : > { %944 = dma.hbm_to_vmem [thread:$0]  (!%p1267_p11), %s1486_s1, 4096, %s1260_s28, [#allocation6], %s1178_s15, %s1178_s15, %s1179_s16  }
  0x28   : > { %s1046_s7 = scalar_lea.hbm %s1488_s3, 2048 }
  0x29   : > { %p1047_p2 = scmp.ne.s32.totalorder %s1488_s3, %s1046_s7  ;;  %p1053_p10 = scmp.lt.u32.totalorder %s1046_s7, %s1488_s3 }
  0x2b   : > { %p1049_p1 = pnand %p1047_p2, %p1020_p13 }
  0x2d   : > { %p1050_p6 = pneg %p1049_p1 }
  0x2f   : > { %p1055_p3 = pnand %p1053_p10, %p1050_p6 }
  0x31   : > { %1058 = shalt.err (!%p1055_p3)
}
  0x32   : > { %s1059_s28 = scalar_lea.vmem %s1271_s6, 2048  ;;  %p1067_p12 = scmp.lt.s32.totalorder %s1271_s6, %s1271_s6 }
  0x33   : > { %p1060_p5 = scmp.ne.s32.totalorder %s1271_s6, %s1059_s28  ;;  %p1068_p0 = scmp.lt.s32.totalorder %s1059_s28, %s1059_s28 }
  0x35   : > { %p1062_p7 = pnand %p1060_p5, %p1020_p13  ;;  %p1069_p2 = por %p1068_p0, %p1067_p12 }
  0x37   : > { %p1063_p9 = pneg %p1062_p7 }
  0x39   : > { %p1070_p1 = pnand %p1069_p2, %p1063_p9 }
  0x3b   : > { %1073 = shalt.err (!%p1070_p1)
}
  0x3c   : > { %947 = dma.hbm_to_vmem [thread:$0]  (!%p1267_p11), %s1488_s3, 2048, %s1271_s6, [#allocation6], %s1178_s15, %s1178_s15, %s1179_s16  }
  0x3d   : > { %s1326_s14 = sadd.s32 1, %s1174_s21   ;;  %s29_s29 = sadd.s32 1, %s1170_s20 }
  0x3e   : > { %s26_s17 = ssub.s32 %s1174_s21, %s1326_s14  ;;  %p36_p13 = scmp.ne.s32.totalorder %s1170_s20, %s1166_s19 }
  0x3f   : > { %p27_p6 = scmp.eq.s32.totalorder %s26_s17, 0  ;;  %p37_p10 = scmp.eq.s32.totalorder %s1174_s21, 0 }
  0x40   : > { %p1498_p3 = scmp.eq.s32.totalorder %s1237_s22, 1  ;;  %p958_p7 = scmp.lt.s32.totalorder %s1174_s21, 2 }
  0x41   : > { %s1342_s27 = scalar_select %p27_p6, %s1170_s20, %s29_s29  }
  0x42   : > { %p1336_p5 = por %p1498_p3, %p36_p13  ;;  %p38_p9 = por %p37_p10, %p36_p13 }
  0x43   : > { %s208_s30 = sand.u32 1, %s1170_s20   ;;  %s739_s6 = sshll.u32 %s1174_s21, 11 }
  0x44   : > { %s1499_s23 = scalar_select %p1336_p5, 1, 0 }
  0x45   : > { %s722_s7 = sshll.u32 %s208_s30, 7  ;;  %s1349_s8 = scalar_lea.hbm %s1485_s0, %s739_s6 }
  0x46   : > { %s212_s9 = scalar_lea.vmem [#allocation2], %s722_s7  ;;  %p1353_p11 = pnand %p958_p7, %p38_p9 }
  0x47   : > { %s220_s10 = sshll.u32 %s212_s9, 4  ;;  %s1357_s28 = scalar_lea.sflag [#allocation3], %s208_s30  ;;  %s1351_s10 = int_to_ptr.vmem [resolvable:$true] %s220_s10 }
  0x48   : > { %s1074_s12 = scalar_lea.hbm %s1349_s8, 2048  ;;  %p1076_p0 = pneg %p1353_p11 }
  0x49   : > { %p1075_p12 = scmp.ne.s32.totalorder %s1349_s8, %s1074_s12  ;;  %s1079_s17 = scalar_lea.hbm %s1485_s0, 4096 }
  0x4a   : > { %p1080_p13 = scmp.lt.u32.totalorder %s1349_s8, %s1485_s0  ;;  %p1081_p6 = scmp.lt.u32.totalorder %s1079_s17, %s1074_s12 }
  0x4b   : > { %p1077_p2 = pnand %p1076_p0, %p1075_p12  ;;  %p1083_p3 = scmp.lt.u32.totalorder %s1074_s12, %s1349_s8 }
  0x4c   : > { %p1082_p10 = por %p1081_p6, %p1080_p13 }
  0x4d   : > { %p1078_p1 = pneg %p1077_p2 }
  0x4e   : > { %p1084_p7 = por %p1083_p3, %p1082_p10 }
  0x50   : > { %p1085_p9 = pnand %p1084_p7, %p1078_p1 }
  0x52   : > { %1088 = shalt.err (!%p1085_p9)
}
  0x53   : > { %s1089_s30 = scalar_lea.vmem %s1351_s10, 2048  ;;  %s1180_s15 = smov [#allocation2]  }
  0x54   : > { %p1090_p12 = scmp.ne.s32.totalorder %s1351_s10, %s1089_s30  ;;  %s1094_s16 = sshll.u32 %s1180_s15, 4  ;;  %s1095_s16 = int_to_ptr.vmem [resolvable:$false] %s1094_s16 }
  0x55   : > { %s1096_s9 = scalar_lea.vmem %s1095_s16, 4096  ;;  %p1097_p4 = scmp.lt.s32.totalorder %s1351_s10, %s1095_s16 }
  0x56   : > { %p1092_p2 = pnand %p1090_p12, %p1076_p0  ;;  %p1098_p13 = scmp.lt.s32.totalorder %s1096_s9, %s1089_s30 }
  0x58   : > { %p1093_p5 = pneg %p1092_p2  ;;  %p1099_p6 = por %p1098_p13, %p1097_p4 }
  0x5a   : > { %p1100_p10 = pnand %p1099_p6, %p1093_p5 }
  0x5c   : > { %1103 = shalt.err (!%p1100_p10)
}
  0x5d   : > { %s1181_s12 = smov 256   ;;  %s1182_s13 = smov 16  }
  0x5e   : > { %951 = dma.hbm_to_vmem [thread:$0]  (!%p1353_p11), %s1349_s8, 2048, %s1351_s10, %s1357_s28, %s1181_s12, %s1181_s12, %s1182_s13  }
  0x5f   : > { %232 = sbr.rel (%p1256_p8) target bundleno = 633 (0x279), region = 40  ;;  %s1388_s29 = sand.u32 (!%p1256_p8), 1, %s1166_s19  }
  0x60   : > { %s727_s17 = sshll.u32 (!%p1256_p8), %s1388_s29, 7  ;;  %s235_s7 = scalar_lea.sflag (!%p1256_p8), [#allocation3], %s1388_s29 }
  0x61   : > { %s1392_s6 = scalar_lea.vmem (!%p1256_p8), [#allocation2], %s727_s17  ;;  %p1501_p4 = scmp.ne.s32.totalorder (!%p1256_p8), %s1494_s24, 0 }
  0x66   : > { %1149 = dma.done.wait (%p1501_p4), %s235_s7, 2048  }
  0x67   : > { %1151 = vsyncadd (%p1501_p4), %s235_s7, 4294965248  ;;  %p1502_p5 = scmp.eq.s32.totalorder %s1237_s22, 0 }
  0x69   : > { %1153 = dma.done.wait (%p1502_p5), [#allocation6], 6144   ;;  %p1503_p8 = pmov %p1502_p5 }
  0x6a   : > { %v307_v0 = vld [vmem:[#allocation5 + $0x80] sm:$0xff]  ;;  %v308_v1 = vld [vmem:[#allocation5 + $0x88] sm:$0xff]  ;;  %v309_v5 = vld [vmem:[#allocation5 + $0x90] sm:$0xff]  ;;  %s730_s8 = sshll.u32 %s1388_s29, 6  ;;  %s740_s15 = sshll.u32 %s1237_s22, 10 }
  0x6b   : > { %1155 = vsyncadd (%p1503_p8), [#allocation6], 4294961152  ;;  %v291_v2 = vld [vmem:[#allocation5] sm:$0xff]  ;;  %v865_v3 = vpack.c.bf16 %v308_v1, %v307_v0  ;;  %v292_v4 = vld [vmem:[#allocation5 + $0x8] sm:$0xff]  ;;  %s272_s28 = scalar_lea.vmem [#allocation8], %s730_s8  ;;  %s1441_s12 = scalar_lea.hbm %s1490_s5, %s740_s15 }
  0x6c   : > { %v310_v6 = vld [vmem:[#allocation5 + $0x98] sm:$0xff]  ;;  %v867_v7 = vpack.c.bf16 %v292_v4, %v291_v2  ;;  %v293_v9 = vld [vmem:[#allocation5 + $0x10] sm:$0xff]  ;;  %v311_v11 = vld [vmem:[#allocation5 + $0xa0] sm:$0xff]  ;;  %s625_s30 = sshll.u32 %s272_s28, 4  ;;  %s612_s13 = scalar_lea.sflag [#allocation4], %s1388_s29  ;;  %s1436_s30 = int_to_ptr.vmem [resolvable:$true] %s625_s30 }
  0x6d   : > { %v869_v8 = vpack.c.bf16 %v310_v6, %v309_v5  ;;  %v294_v10 = vld [vmem:[#allocation5 + $0x18] sm:$0xff]  ;;  %866 = vmatprep.subr.bf16.mxu0 %v865_v3  ;;  %v312_v12 = vld [vmem:[#allocation5 + $0xa8] sm:$0xff]  ;;  %v295_v15 = vld [vmem:[#allocation5 + $0x20] sm:$0xff]  ;;  %s1104_s17 = scalar_lea.vmem %s1436_s30, 1024  ;;  %p1504_p0 = scmp.ne.s32.totalorder %s1499_s23, 0 }
  0x6e   : > { %868 = vmatpush3.bf16.msra.mxu0 %v867_v7  ;;  %v871_v13 = vpack.c.bf16 %v294_v10, %v293_v9  ;;  %v873_v14 = vpack.c.bf16 %v312_v12, %v311_v11  ;;  %v296_v16 = vld [vmem:[#allocation5 + $0x28] sm:$0xff]  ;;  %v313_v17 = vld [vmem:[#allocation5 + $0xb0] sm:$0xff]  ;;  %v314_v18 = vld [vmem:[#allocation5 + $0xb8] sm:$0xff]  ;;  %p1105_p11 = scmp.ne.s32.totalorder %s1436_s30, %s1104_s17  ;;  %s1183_s22 = smov [#allocation8]  }
  0x6f   : > { %870 = vmatprep.subr.bf16.mxu0 %v869_v8  ;;  %v875_v19 = vpack.c.bf16 %v296_v16, %v295_v15  ;;  %v877_v20 = vpack.c.bf16 %v314_v18, %v313_v17  ;;  %v297_v21 = vld [vmem:[#allocation5 + $0x30] sm:$0xff]  ;;  %v298_v22 = vld [vmem:[#allocation5 + $0x38] sm:$0xff]  ;;  %v315_v23 = vld [vmem:[#allocation5 + $0xc0] sm:$0xff]  ;;  %s1108_s7 = sshll.u32 %s1183_s22, 4  ;;  %s1109_s7 = int_to_ptr.vmem [resolvable:$false] %s1108_s7 }
  0x70   : > { %v316_v24 = vld [vmem:[#allocation5 + $0xc8] sm:$0xff]  ;;  %v879_v26 = vpack.c.bf16 %v298_v22, %v297_v21  ;;  %v299_v28 = vld [vmem:[#allocation5 + $0x40] sm:$0xff]  ;;  %v317_v30 = vld [vmem:[#allocation5 + $0xd0] sm:$0xff]  ;;  %p1106_p1 = pnand %p1105_p11, %p1504_p0  ;;  %p1111_p7 = scmp.lt.s32.totalorder %s1436_s30, %s1109_s7 }
  0x71   : > { %v276_v25 = vld [vmem:[%s1392_s6 + $0x8] sm:$0xff]  ;;  %v881_v27 = vpack.c.bf16 %v316_v24, %v315_v23  ;;  %v318_v31 = vld [vmem:[#allocation5 + $0xd8] sm:$0xff]  ;;  %v475_v33 = vld [vmem:[#allocation7] sm:$0xff] }
  0x72   : > { %872 = vmatpush3.bf16.msra.mxu0 %v871_v13  ;;  %394 = vmatprep.mubr.f32.mxu0 %v276_v25  ;;  %v300_v29 = vld [vmem:[#allocation5 + $0x48] sm:$0xff]  ;;  %v477_v35 = vld [vmem:[#allocation7 + $0x10] sm:$0xff]  ;;  %v885_v36 = vpack.c.bf16 %v318_v31, %v317_v30  ;;  %v302_v38 = vld [vmem:[#allocation5 + $0x58] sm:$0xff]  ;;  %p1107_p3 = pneg %p1106_p1 }
  0x73   : > { %874 = vmatprep.subr.bf16.mxu0 %v873_v14  ;;  %v883_v32 = vpack.c.bf16 %v300_v29, %v299_v28  ;;  %v476_v34 = vld [vmem:[#allocation7 + $0x8] sm:$0xff]  ;;  %v301_v37 = vld [vmem:[#allocation5 + $0x50] sm:$0xff]  ;;  %v478_v40 = vld [vmem:[#allocation7 + $0x18] sm:$0xff] }
  0x74   : > { %v897_v39 = vpack.c.bf16 %v476_v34, %v475_v33  ;;  %v319_v41 = vld [vmem:[#allocation5 + $0xe0] sm:$0xff]  ;;  %v320_v42 = vld [vmem:[#allocation5 + $0xe8] sm:$0xff]  ;;  %v901_v43 = vpack.c.bf16 %v478_v40, %v477_v35  ;;  %v887_v44 = vpack.c.bf16 %v302_v38, %v301_v37  ;;  %v321_v48 = vld [vmem:[#allocation5 + $0xf0] sm:$0xff] }
  0x75   : > { %v889_v45 = vpack.c.bf16 %v320_v42, %v319_v41  ;;  %v303_v46 = vld [vmem:[#allocation5 + $0x60] sm:$0xff]  ;;  %v304_v47 = vld [vmem:[#allocation5 + $0x68] sm:$0xff]  ;;  %v322_v49 = vld [vmem:[#allocation5 + $0xf8] sm:$0xff] }
  0x76   : > { %876 = vmatpush3.bf16.msra.mxu0 %v875_v19  ;;  %898 = vmatprep.subr.bf16.mxu1 %v897_v39  ;;  %v891_v50 = vpack.c.bf16 %v304_v47, %v303_v46  ;;  %v893_v51 = vpack.c.bf16 %v322_v49, %v321_v48  ;;  %v305_v52 = vld [vmem:[#allocation5 + $0x70] sm:$0xff]  ;;  %v306_v53 = vld [vmem:[#allocation5 + $0x78] sm:$0xff]  ;;  %v275_v55 = vld [vmem:[%s1392_s6] sm:$0xff] }
  0x77   : > { %878 = vmatprep.subr.bf16.mxu0 %v877_v20  ;;  %900 = vmatpush3.bf16.msra.mxu1 %v897_v39  ;;  %v895_v54 = vpack.c.bf16 %v306_v53, %v305_v52  ;;  %v278_v56 = vld [vmem:[%s1392_s6 + $0x18] sm:$0xff]  ;;  %v277_v57 = vld [vmem:[%s1392_s6 + $0x10] sm:$0xff]  ;;  %v280_v58 = vld [vmem:[%s1392_s6 + $0x28] sm:$0xff] }
  0x78   : > { %902 = vmatprep.subr.bf16.mxu1 %v901_v43  ;;  %v279_v59 = vld [vmem:[%s1392_s6 + $0x20] sm:$0xff]  ;;  %v282_v60 = vld [vmem:[%s1392_s6 + $0x38] sm:$0xff]  ;;  %v281_v61 = vld [vmem:[%s1392_s6 + $0x30] sm:$0xff] }
  0x79   : > { %v284_v62 = vld [vmem:[%s1392_s6 + $0x48] sm:$0xff]  ;;  %v283_v63 = vld [vmem:[%s1392_s6 + $0x40] sm:$0xff]  ;;  %v286_v0 = vld [vmem:[%s1392_s6 + $0x58] sm:$0xff] }
  0x7a   : > { %880 = vmatpush3.bf16.msra.mxu0 %v879_v26  ;;  %v285_v1 = vld [vmem:[%s1392_s6 + $0x50] sm:$0xff]  ;;  %v288_v2 = vld [vmem:[%s1392_s6 + $0x68] sm:$0xff]  ;;  %v287_v3 = vld [vmem:[%s1392_s6 + $0x60] sm:$0xff] }
  0x7b   : > { %882 = vmatprep.subr.bf16.mxu0 %v881_v27  ;;  %904 = vmatpush3.bf16.msra.mxu1 %v901_v43  ;;  %v290_v4 = vld [vmem:[%s1392_s6 + $0x78] sm:$0xff]  ;;  %v289_v5 = vld [vmem:[%s1392_s6 + $0x70] sm:$0xff]  ;;  %v479_v6 = vld [vmem:[#allocation7 + $0x20] sm:$0xff]  ;;  %s1110_s6 = scalar_lea.vmem %s1109_s7, 2048 }
  0x7c   : > { %v480_v7 = vld [vmem:[#allocation7 + $0x28] sm:$0xff]  ;;  %v481_v9 = vld [vmem:[#allocation7 + $0x30] sm:$0xff]  ;;  %v482_v10 = vld [vmem:[#allocation7 + $0x38] sm:$0xff]  ;;  %p1112_p9 = scmp.lt.s32.totalorder %s1110_s6, %s1104_s17 }
  0x7d   : > { %v905_v8 = vpack.c.bf16 %v480_v7, %v479_v6  ;;  %v909_v11 = vpack.c.bf16 %v482_v10, %v481_v9  ;;  %v483_v12 = vld [vmem:[#allocation7 + $0x40] sm:$0xff]  ;;  %v484_v13 = vld [vmem:[#allocation7 + $0x48] sm:$0xff]  ;;  %v485_v15 = vld [vmem:[#allocation7 + $0x50] sm:$0xff] }
  0x7e   : > { %884 = vmatpush3.bf16.msra.mxu0 %v883_v32  ;;  %v913_v14 = vpack.c.bf16 %v484_v13, %v483_v12  ;;  %v486_v16 = vld [vmem:[#allocation7 + $0x58] sm:$0xff]  ;;  %v487_v18 = vld [vmem:[#allocation7 + $0x60] sm:$0xff]  ;;  %v488_v19 = vld [vmem:[#allocation7 + $0x68] sm:$0xff]  ;;  %p1113_p12 = por %p1112_p9, %p1111_p7 }
  0x7f   : > { %886 = vmatprep.subr.bf16.mxu0 %v885_v36  ;;  %906 = vmatprep.subr.bf16.mxu1 %v905_v8  ;;  %v917_v17 = vpack.c.bf16 %v486_v16, %v485_v15  ;;  %v921_v20 = vpack.c.bf16 %v488_v19, %v487_v18  ;;  %v489_v21 = vld [vmem:[#allocation7 + $0x70] sm:$0xff]  ;;  %v490_v22 = vld [vmem:[#allocation7 + $0x78] sm:$0xff]  ;;  %v1421_v25 = vld [vmem:[%s1487_s2] ss:$0 sm:$0xff] }
  0x80   : > { %908 = vmatpush3.bf16.msra.mxu1 %v905_v8  ;;  %v925_v23 = vpack.c.bf16 %v490_v22, %v489_v21  ;;  %p1114_p2 = pnand %p1113_p12, %p1107_p3 }
  0x81   : > { %910 = vmatprep.subr.bf16.mxu1 %v909_v11 }
  0x82   : > { %888 = vmatpush3.bf16.msra.mxu0 %v887_v44 }
  0x83   : > { %890 = vmatprep.subr.bf16.mxu0 %v889_v45 }
  0x84   : > { %912 = vmatpush3.bf16.msra.mxu1 %v909_v11 }
  0x85   : > { %914 = vmatprep.subr.bf16.mxu1 %v913_v14 }
  0x86   : > { %892 = vmatpush3.bf16.msra.mxu0 %v891_v50 }
  0x87   : > { %894 = vmatprep.subr.bf16.mxu0 %v893_v51 }
  0x88   : > { %916 = vmatpush3.bf16.msra.mxu1 %v913_v14 }
  0x89   : > { %918 = vmatprep.subr.bf16.mxu1 %v917_v17 }
  0x8a   : > { %896 = vmatpush3.bf16.msra.mxu0 %v895_v54 }
  0x8c   : > { %920 = vmatpush3.bf16.msra.mxu1 %v917_v17 }
  0x8d   : > { %395 = vmatmul.mubr.f32.vlgmr.msra.gmra.mrb[0].mxu0 %v275_v55  ;;  %922 = vmatprep.subr.bf16.mxu1 %v921_v20 }
  0x8e   : > { %399 = vmatprep.mubr.f32.mxu0 %v278_v56 }
  0x90   : > { %924 = vmatpush3.bf16.msra.mxu1 %v921_v20 }
  0x91   : > { %400 = vmatmul.mubr.f32.gmra.mrb[2].mxu0 %v277_v57  ;;  %926 = vmatprep.subr.bf16.mxu1 %v925_v23 }
  0x92   : > { %404 = vmatprep.mubr.f32.mxu0 %v280_v58 }
  0x94   : > { %928 = vmatpush3.bf16.msra.mxu1 %v925_v23 }
  0x95   : > { %405 = vmatmul.mubr.f32.gmra.mrb[4].mxu0 %v279_v59 }
  0x96   : > { %409 = vmatprep.mubr.f32.mxu0 %v282_v60 }
  0x99   : > { %410 = vmatmul.mubr.f32.gmra.mrb[6].mxu0 %v281_v61 }
  0x9a   : > { %414 = vmatprep.mubr.f32.mxu0 %v284_v62 }
  0x9d   : > { %415 = vmatmul.mubr.f32.gmra.mrb[8].mxu0 %v283_v63 }
  0x9e   : > { %419 = vmatprep.mubr.f32.mxu0 %v286_v0 }
  0xa1   : > { %420 = vmatmul.mubr.f32.gmra.mrb[10].mxu0 %v285_v1 }
  0xa2   : > { %424 = vmatprep.mubr.f32.mxu0 %v288_v2 }
  0xa5   : > { %425 = vmatmul.mubr.f32.gmra.mrb[12].mxu0 %v287_v3 }
  0xa6   : > { %429 = vmatprep.mubr.f32.mxu0 %v290_v4 }
  0xa9   : > { %430 = vmatmul.mubr.f32.gmra.mrb[14].mxu0 %v289_v5 }
 0x160   : > { %v773_v24 = vpop.f32.mrb[0].mxu0 }
 0x161   : > { %v774_v26 = vpop.f32.mrb[1].mxu0 }
 0x162   : > { %v775_v27 = vadd.f32 %v774_v26, %v773_v24 }
 0x164   : > { %v397_v28 = vadd.f32 %v775_v27, %v1421_v25  ;;  %v776_v29 = vpop.f32.mrb[2].mxu0 }
 0x165   : > { %v777_v30 = vpop.f32.mrb[3].mxu0 }
 0x166   : > { %v443_v31 = vmul.f32 0.70710677, %v397_v28  ;;  %v778_v32 = vadd.f32 %v777_v30, %v776_v29  ;;  %v435_v49 = vmul.f32 0.5, %v397_v28 }
 0x168   : > { %v402_v33 = vadd.f32 %v778_v32, %v1421_v25  ;;  %v779_v34 = vpop.f32.mrb[4].mxu0  ;;  %1002 = verf.f32 %v443_v31 }
 0x169   : > { %v780_v35 = vpop.f32.mrb[5].mxu0 }
 0x16a   : > { %v444_v36 = vmul.f32 0.70710677, %v402_v33  ;;  %v781_v37 = vadd.f32 %v780_v35, %v779_v34  ;;  %v436_v58 = vmul.f32 0.5, %v402_v33  ;;  %v732_v33 = vld [vmem:[%s1489_s4] ss:$0 sm:$0xff] }
 0x16c   : > { %1004 = verf.f32 %v444_v36  ;;  %v407_v38 = vadd.f32 %v781_v37, %v1421_v25  ;;  %v782_v39 = vpop.f32.mrb[6].mxu0 }
 0x16d   : > { %v783_v40 = vpop.f32.mrb[7].mxu0 }
 0x16e   : > { %v445_v41 = vmul.f32 0.70710677, %v407_v38  ;;  %v784_v42 = vadd.f32 %v783_v40, %v782_v39  ;;  %v437_v3 = vmul.f32 0.5, %v407_v38 }
 0x170   : > { %1006 = verf.f32 %v445_v41  ;;  %v412_v43 = vadd.f32 %v784_v42, %v1421_v25  ;;  %v785_v44 = vpop.f32.mrb[8].mxu0 }
 0x171   : > { %v786_v45 = vpop.f32.mrb[9].mxu0 }
 0x172   : > { %v1003_v46 = vpop.eup %1002  ;;  %v446_v47 = vmul.f32 0.70710677, %v412_v43  ;;  %v787_v48 = vadd.f32 %v786_v45, %v785_v44  ;;  %v438_v12 = vmul.f32 0.5, %v412_v43 }
 0x173   : > { %v459_v50 = vadd.f32 1.0, %v1003_v46 }
 0x174   : > { %1008 = verf.f32 %v446_v47  ;;  %v417_v51 = vadd.f32 %v787_v48, %v1421_v25  ;;  %v788_v52 = vpop.f32.mrb[10].mxu0 }
 0x175   : > { %v789_v53 = vpop.f32.mrb[11].mxu0  ;;  %v467_v54 = vmul.f32 %v459_v50, %v435_v49 }
 0x176   : > { %v1005_v55 = vpop.eup %1004  ;;  %v447_v56 = vmul.f32 0.70710677, %v417_v51  ;;  %v790_v57 = vadd.f32 %v789_v53, %v788_v52  ;;  %v439_v18 = vmul.f32 0.5, %v417_v51 }
 0x177   : > { %853 = vmatprep.mubr.f32.mxu1 %v467_v54  ;;  %v460_v59 = vadd.f32 1.0, %v1005_v55 }
 0x178   : > { %1010 = verf.f32 %v447_v56  ;;  %v422_v60 = vadd.f32 %v790_v57, %v1421_v25  ;;  %v791_v61 = vpop.f32.mrb[12].mxu0 }
 0x179   : > { %v792_v62 = vpop.f32.mrb[13].mxu0  ;;  %v468_v63 = vmul.f32 %v460_v59, %v436_v58 }
 0x17a   : > { %v1007_v0 = vpop.eup %1006  ;;  %v448_v1 = vmul.f32 0.70710677, %v422_v60  ;;  %v793_v2 = vadd.f32 %v792_v62, %v791_v61  ;;  %v440_v22 = vmul.f32 0.5, %v422_v60 }
 0x17b   : > { %854 = vmatmul.mubr.f32.vlgmr.msra.gmra.mrb[0].mxu1 %v468_v63  ;;  %v461_v4 = vadd.f32 1.0, %v1007_v0 }
 0x17c   : > { %1012 = verf.f32 %v448_v1  ;;  %v427_v5 = vadd.f32 %v793_v2, %v1421_v25  ;;  %v794_v6 = vpop.f32.mrb[14].mxu0 }
 0x17d   : > { %v795_v7 = vpop.f32.mrb[15].mxu0  ;;  %v469_v8 = vmul.f32 %v461_v4, %v437_v3 }
 0x17e   : > { %v1009_v9 = vpop.eup %1008  ;;  %v449_v10 = vmul.f32 0.70710677, %v427_v5  ;;  %v796_v11 = vadd.f32 %v795_v7, %v794_v6  ;;  %v441_v27 = vmul.f32 0.5, %v427_v5 }
 0x17f   : > { %856 = vmatprep.mubr.f32.mxu1 %v469_v8  ;;  %v462_v13 = vadd.f32 1.0, %v1009_v9 }
 0x180   : > { %1014 = verf.f32 %v449_v10  ;;  %v432_v14 = vadd.f32 %v796_v11, %v1421_v25 }
 0x181   : > { %v470_v15 = vmul.f32 %v462_v13, %v438_v12 }
 0x182   : > { %v1011_v16 = vpop.eup %1010  ;;  %v450_v17 = vmul.f32 0.70710677, %v432_v14  ;;  %v442_v30 = vmul.f32 0.5, %v432_v14 }
 0x183   : > { %857 = vmatmul.mubr.f32.gmra.mrb[2].mxu1 %v470_v15  ;;  %v463_v19 = vadd.f32 1.0, %v1011_v16 }
 0x184   : > { %1016 = verf.f32 %v450_v17 }
 0x185   : > { %v471_v20 = vmul.f32 %v463_v19, %v439_v18 }
 0x186   : > { %v1013_v21 = vpop.eup %1012 }
 0x187   : > { %859 = vmatprep.mubr.f32.mxu1 %v471_v20  ;;  %v464_v23 = vadd.f32 1.0, %v1013_v21 }
 0x189   : > { %v472_v24 = vmul.f32 %v464_v23, %v440_v22 }
 0x18a   : > { %v1015_v26 = vpop.eup %1014 }
 0x18b   : > { %860 = vmatmul.mubr.f32.gmra.mrb[4].mxu1 %v472_v24  ;;  %v465_v28 = vadd.f32 1.0, %v1015_v26 }
 0x18d   : > { %v473_v29 = vmul.f32 %v465_v28, %v441_v27 }
 0x18e   : > { %v1017_v25 = vpop.eup %1016 }
 0x18f   : > { %862 = vmatprep.mubr.f32.mxu1 %v473_v29  ;;  %v466_v31 = vadd.f32 1.0, %v1017_v25 }
 0x191   : > { %v474_v32 = vmul.f32 %v466_v31, %v442_v30 }
 0x193   : > { %863 = vmatmul.mubr.f32.gmra.mrb[6].mxu1 %v474_v32 }
 0x24e   : > { %v855_v34 = vpop.f32.mrb[0].mxu1 }
 0x24f   : > { %v570_v35 = vadd.f32 %v855_v34, %v732_v33  ;;  %v564_v36 = vpop.f32.mrb[1].mxu1 }
 0x250   : > { %v565_v37 = vadd.f32 %v732_v33, %v564_v36 }
 0x251   : > { %604 = vst [vmem:[%s272_s28 + $0x8] sm:$0xff] %v570_v35 }
 0x252   : > { %603 = vst [vmem:[%s272_s28] sm:$0xff] %v565_v37 }
 0x256   : > { %v858_v38 = vpop.f32.mrb[2].mxu1 }
 0x257   : > { %v580_v39 = vadd.f32 %v858_v38, %v732_v33  ;;  %v574_v40 = vpop.f32.mrb[3].mxu1 }
 0x258   : > { %v575_v41 = vadd.f32 %v732_v33, %v574_v40 }
 0x259   : > { %606 = vst [vmem:[%s272_s28 + $0x18] sm:$0xff] %v580_v39 }
 0x25a   : > { %605 = vst [vmem:[%s272_s28 + $0x10] sm:$0xff] %v575_v41 }
 0x25e   : > { %v861_v42 = vpop.f32.mrb[4].mxu1 }
 0x25f   : > { %v590_v43 = vadd.f32 %v861_v42, %v732_v33  ;;  %v584_v44 = vpop.f32.mrb[5].mxu1 }
 0x260   : > { %v585_v45 = vadd.f32 %v732_v33, %v584_v44 }
 0x261   : > { %608 = vst [vmem:[%s272_s28 + $0x28] sm:$0xff] %v590_v43 }
 0x262   : > { %607 = vst [vmem:[%s272_s28 + $0x20] sm:$0xff] %v585_v45 }
 0x266   : > { %v864_v46 = vpop.f32.mrb[6].mxu1 }
 0x267   : > { %v600_v47 = vadd.f32 %v864_v46, %v732_v33  ;;  %v594_v48 = vpop.f32.mrb[7].mxu1 }
 0x268   : > { %v595_v49 = vadd.f32 %v732_v33, %v594_v48 }
 0x269   : > { %610 = vst [vmem:[%s272_s28 + $0x38] sm:$0xff] %v600_v47 }
 0x26a   : > { %609 = vst [vmem:[%s272_s28 + $0x30] sm:$0xff] %v595_v49 }
 0x26b   : > { %1117 = shalt.err (!%p1114_p2)
}
 0x26c   : > { %s1118_s24 = scalar_lea.hbm %s1441_s12, 1024  ;;  %s1122_s10 = scalar_lea.hbm %s1490_s5, 2048 }
 0x26d   : > { %p1119_p13 = scmp.ne.s32.totalorder %s1441_s12, %s1118_s24  ;;  %p1123_p4 = scmp.lt.u32.totalorder %s1441_s12, %s1490_s5 }
 0x26e   : > { %p1124_p5 = scmp.lt.u32.totalorder %s1122_s10, %s1118_s24  ;;  %p1126_p11 = scmp.lt.u32.totalorder %s1118_s24, %s1441_s12 }
 0x26f   : > { %p1120_p6 = pnand %p1119_p13, %p1504_p0 }
 0x270   : > { %p1125_p8 = por %p1124_p5, %p1123_p4 }
 0x271   : > { %p1121_p10 = pneg %p1120_p6 }
 0x272   : > { %p1127_p1 = por %p1126_p11, %p1125_p8 }
 0x274   : > { %p1128_p3 = pnand %p1127_p1, %p1121_p10 }
 0x276   : > { %1131 = shalt.err (!%p1128_p3)
}
 0x277   : > { %s1184_s15 = smov 128   ;;  %s1185_s16 = smov 8  }
 0x278   : > { %939 = dma.vmem_to_hbm [thread:$0]  (%p1504_p0), %s1436_s30, 1024, %s1441_s12, %s612_s13, %s1184_s15, %s1184_s15, %s1185_s16  }
 0x279 PF: > { %s640_s9 = sand.u32 1, %s1162_s18   ;;  %p1505_p7 = scmp.ne.s32.totalorder %s1495_s25, 0 }
 0x27a   : > { %p1506_p9 = scmp.ge.s32.totalorder %s1174_s21, 2  ;;  %s641_s17 = scalar_lea.sflag [#allocation4], %s640_s9 }
 0x27c   : > { %p953_p12 = pnand %p1506_p9, %p1505_p7 }
 0x27e   : > { %1157 = dma.done.wait (!%p953_p12), %s641_s17, 1024  }
 0x27f   : > { %1159 = vsyncadd (!%p953_p12), %s641_s17, 4294966272  ;;  %p19_p2 = scmp.ge.s32.totalorder %s1326_s14, 4   ;;  %s1507_s18 = smov %s1166_s19 }
 0x280   : > { %s1508_s19 = smov %s1170_s20  ;;  %s1509_s20 = smov %s1342_s27 }
 0x281   : > { %s1510_s21 = smov %s1326_s14  ;;  %21 = sbr.rel (!%p19_p2) target bundleno = 6 (0x6), region = 93 }
 0x288   :  { %646 = vsyncpa [#allocation3], 1 }
 0x289   :  { %648 = vsyncpa [#allocation3 + $0x1], 1 }
 0x28a   :  { %649 = vsyncpa [#allocation6], 1 }
 0x28b   :  { %650 = vsyncpa [#allocation4], 1 }
 0x28c   :  { %652 = vsyncpa [#allocation4 + $0x1], 1 }

// kernel: tpu_custom_call.1
= control target key start
LH: loop header
LB: loop body
LE: loop exit
PB: predicated region body
PF: predicated region fallthrough
CT: control target
= control target key end

     0   :  { %10 = vsyncpa [#allocation3], 0  ;;  %s1485_s0 = inlined_call_operand.hbm [shape: f32[128,256], index: 0, kind: input, shape index: {}]   ;;  %s1486_s1 = inlined_call_operand.hbm [shape: f32[256,128], index: 1, kind: input, shape index: {}]   ;;  %s1487_s2 = inlined_call_operand.vmem [shape: f32[1,128], index: 2, kind: input, shape index: {}]   ;;  %s1488_s3 = inlined_call_operand.hbm [shape: f32[128,128], index: 3, kind: input, shape index: {}]   ;;  %s1489_s4 = inlined_call_operand.vmem [shape: f32[1,128], index: 4, kind: input, shape index: {}]   ;;  %s1490_s5 = inlined_call_operand.hbm [shape: f32[128,128], index: 5, kind: output, shape index: {}]  }
   0x1   :  { %12 = vsyncpa [#allocation3 + $0x1], 0 }
   0x2   :  { %13 = vsyncpa [#allocation6], 0 }
   0x3   :  { %14 = vsyncpa [#allocation4], 0 }
   0x4   :  { %16 = vsyncpa [#allocation4 + $0x1], 0  ;;  %s1216_s18 = smov 0   ;;  %s1218_s19 = smov 0  }
   0x5   :  { %s1220_s20 = smov 0   ;;  %s1222_s21 = smov 0  }
   0x6 LB: > { %s1237_s22 = sadd.s32 4294967295, %s1174_s21   ;;  %s717_s23 = sadd.s32 4294967294, %s1174_s21   ;;  %s1174_s21 = sphi %s1222_s21, %s1510_s21   ;;  %s1170_s20 = sphi %s1220_s20, %s1509_s20   ;;  %s1166_s19 = sphi %s1218_s19, %s1508_s19   ;;  %s1162_s18 = sphi %s1216_s18, %s1507_s18  }
   0x7   : > { %p42_p0 = scmp.ne.s32.totalorder %s1166_s19, %s1162_s18  ;;  %p1491_p1 = scmp.eq.s32.totalorder %s1237_s22, 0 }
   0x8   : > { %p156_p3 = scmp.eq.s32.totalorder %s717_s23, 1  ;;  %p718_p5 = scmp.ge.s32.totalorder %s1174_s21, 1 }
   0x9   : > { %p1246_p4 = por %p1491_p1, %p42_p0  ;;  %p163_p7 = scmp.lt.s32.totalorder %s1174_s21, 3 }
   0xa   : > { %p1251_p6 = por %p156_p3, %p42_p0  ;;  %s1176_s27 = smov [#allocation5]  }
   0xb   : > { %s1494_s24 = scalar_select %p1246_p4, 1, 0 }
   0xc   : > { %s1495_s25 = scalar_select %p1251_p6, 1, 0 }
   0xd   : > { %p1256_p8 = pnand %p718_p5, %p163_p7  ;;  %s175_s28 = sshll.u32 %s1176_s27, 4  ;;  %s1260_s28 = int_to_ptr.vmem [resolvable:$true] %s175_s28 }
   0xe   : > { %s1177_s30 = smov [#allocation7]   ;;  %s1018_s9 = scalar_lea.hbm %s1486_s1, 4096 }
   0xf   : > { %p941_p9 = pneg %p1256_p8  ;;  %s191_s6 = sshll.u32 %s1177_s30, 4  ;;  %s1271_s6 = int_to_ptr.vmem [resolvable:$true] %s191_s6 }
  0x10   : > { %p1019_p12 = scmp.ne.s32.totalorder %s1486_s1, %s1018_s9  ;;  %p1025_p5 = scmp.lt.u32.totalorder %s1018_s9, %s1486_s1 }
  0x11   : > { %p1267_p11 = pnand %p941_p9, %p1491_p1 }
  0x13   : > { %p1020_p13 = pneg %p1267_p11 }
  0x15   : > { %p1021_p0 = pnand %p1020_p13, %p1019_p12 }
  0x17   : > { %p1022_p3 = pneg %p1021_p0 }
  0x19   : > { %p1027_p7 = pnand %p1025_p5, %p1022_p3 }
  0x1b   : > { %1030 = shalt.err (!%p1027_p7)
}
  0x1c   : > { %s1031_s14 = scalar_lea.vmem %s1260_s28, 4096  ;;  %p1039_p2 = scmp.lt.s32.totalorder %s1260_s28, %s1260_s28 }
  0x1d   : > { %p1032_p9 = scmp.ne.s32.totalorder %s1260_s28, %s1031_s14  ;;  %p1040_p12 = scmp.lt.s32.totalorder %s1031_s14, %s1031_s14 }
  0x1f   : > { %p1034_p10 = pnand %p1032_p9, %p1020_p13  ;;  %p1041_p0 = por %p1040_p12, %p1039_p2 }
  0x21   : > { %p1035_p1 = pneg %p1034_p10 }
  0x23   : > { %p1042_p6 = pnand %p1041_p0, %p1035_p1 }
  0x25   : > { %1045 = shalt.err (!%p1042_p6)
}
  0x26   : > { %s1178_s15 = smov 128   ;;  %s1179_s16 = smov 8  }
  0x27   : > { %944 = dma.hbm_to_vmem [thread:$0]  (!%p1267_p11), %s1486_s1, 4096, %s1260_s28, [#allocation6], %s1178_s15, %s1178_s15, %s1179_s16  }
  0x28   : > { %s1046_s7 = scalar_lea.hbm %s1488_s3, 2048 }
  0x29   : > { %p1047_p2 = scmp.ne.s32.totalorder %s1488_s3, %s1046_s7  ;;  %p1053_p10 = scmp.lt.u32.totalorder %s1046_s7, %s1488_s3 }
  0x2b   : > { %p1049_p1 = pnand %p1047_p2, %p1020_p13 }
  0x2d   : > { %p1050_p6 = pneg %p1049_p1 }
  0x2f   : > { %p1055_p3 = pnand %p1053_p10, %p1050_p6 }
  0x31   : > { %1058 = shalt.err (!%p1055_p3)
}
  0x32   : > { %s1059_s28 = scalar_lea.vmem %s1271_s6, 2048  ;;  %p1067_p12 = scmp.lt.s32.totalorder %s1271_s6, %s1271_s6 }
  0x33   : > { %p1060_p5 = scmp.ne.s32.totalorder %s1271_s6, %s1059_s28  ;;  %p1068_p0 = scmp.lt.s32.totalorder %s1059_s28, %s1059_s28 }
  0x35   : > { %p1062_p7 = pnand %p1060_p5, %p1020_p13  ;;  %p1069_p2 = por %p1068_p0, %p1067_p12 }
  0x37   : > { %p1063_p9 = pneg %p1062_p7 }
  0x39   : > { %p1070_p1 = pnand %p1069_p2, %p1063_p9 }
  0x3b   : > { %1073 = shalt.err (!%p1070_p1)
}
  0x3c   : > { %947 = dma.hbm_to_vmem [thread:$0]  (!%p1267_p11), %s1488_s3, 2048, %s1271_s6, [#allocation6], %s1178_s15, %s1178_s15, %s1179_s16  }
  0x3d   : > { %s1326_s14 = sadd.s32 1, %s1174_s21   ;;  %s29_s29 = sadd.s32 1, %s1170_s20 }
  0x3e   : > { %s26_s17 = ssub.s32 %s1174_s21, %s1326_s14  ;;  %p36_p13 = scmp.ne.s32.totalorder %s1170_s20, %s1166_s19 }
  0x3f   : > { %p27_p6 = scmp.eq.s32.totalorder %s26_s17, 0  ;;  %p37_p10 = scmp.eq.s32.totalorder %s1174_s21, 0 }
  0x40   : > { %p1498_p3 = scmp.eq.s32.totalorder %s1237_s22, 1  ;;  %p958_p7 = scmp.lt.s32.totalorder %s1174_s21, 2 }
  0x41   : > { %s1342_s27 = scalar_select %p27_p6, %s1170_s20, %s29_s29  }
  0x42   : > { %p1336_p5 = por %p1498_p3, %p36_p13  ;;  %p38_p9 = por %p37_p10, %p36_p13 }
  0x43   : > { %s208_s30 = sand.u32 1, %s1170_s20   ;;  %s739_s6 = sshll.u32 %s1174_s21, 11 }
  0x44   : > { %s1499_s23 = scalar_select %p1336_p5, 1, 0 }
  0x45   : > { %s722_s7 = sshll.u32 %s208_s30, 7  ;;  %s1349_s8 = scalar_lea.hbm %s1485_s0, %s739_s6 }
  0x46   : > { %s212_s9 = scalar_lea.vmem [#allocation2], %s722_s7  ;;  %p1353_p11 = pnand %p958_p7, %p38_p9 }
  0x47   : > { %s220_s10 = sshll.u32 %s212_s9, 4  ;;  %s1357_s28 = scalar_lea.sflag [#allocation3], %s208_s30  ;;  %s1351_s10 = int_to_ptr.vmem [resolvable:$true] %s220_s10 }
  0x48   : > { %s1074_s12 = scalar_lea.hbm %s1349_s8, 2048  ;;  %p1076_p0 = pneg %p1353_p11 }
  0x49   : > { %p1075_p12 = scmp.ne.s32.totalorder %s1349_s8, %s1074_s12  ;;  %s1079_s17 = scalar_lea.hbm %s1485_s0, 4096 }
  0x4a   : > { %p1080_p13 = scmp.lt.u32.totalorder %s1349_s8, %s1485_s0  ;;  %p1081_p6 = scmp.lt.u32.totalorder %s1079_s17, %s1074_s12 }
  0x4b   : > { %p1077_p2 = pnand %p1076_p0, %p1075_p12  ;;  %p1083_p3 = scmp.lt.u32.totalorder %s1074_s12, %s1349_s8 }
  0x4c   : > { %p1082_p10 = por %p1081_p6, %p1080_p13 }
  0x4d   : > { %p1078_p1 = pneg %p1077_p2 }
  0x4e   : > { %p1084_p7 = por %p1083_p3, %p1082_p10 }
  0x50   : > { %p1085_p9 = pnand %p1084_p7, %p1078_p1 }
  0x52   : > { %1088 = shalt.err (!%p1085_p9)
}
  0x53   : > { %s1089_s30 = scalar_lea.vmem %s1351_s10, 2048  ;;  %s1180_s15 = smov [#allocation2]  }
  0x54   : > { %p1090_p12 = scmp.ne.s32.totalorder %s1351_s10, %s1089_s30  ;;  %s1094_s16 = sshll.u32 %s1180_s15, 4  ;;  %s1095_s16 = int_to_ptr.vmem [resolvable:$false] %s1094_s16 }
  0x55   : > { %s1096_s9 = scalar_lea.vmem %s1095_s16, 4096  ;;  %p1097_p4 = scmp.lt.s32.totalorder %s1351_s10, %s1095_s16 }
  0x56   : > { %p1092_p2 = pnand %p1090_p12, %p1076_p0  ;;  %p1098_p13 = scmp.lt.s32.totalorder %s1096_s9, %s1089_s30 }
  0x58   : > { %p1093_p5 = pneg %p1092_p2  ;;  %p1099_p6 = por %p1098_p13, %p1097_p4 }
  0x5a   : > { %p1100_p10 = pnand %p1099_p6, %p1093_p5 }
  0x5c   : > { %1103 = shalt.err (!%p1100_p10)
}
  0x5d   : > { %s1181_s12 = smov 256   ;;  %s1182_s13 = smov 16  }
  0x5e   : > { %951 = dma.hbm_to_vmem [thread:$0]  (!%p1353_p11), %s1349_s8, 2048, %s1351_s10, %s1357_s28, %s1181_s12, %s1181_s12, %s1182_s13  }
  0x5f   : > { %232 = sbr.rel (%p1256_p8) target bundleno = 633 (0x279), region = 40  ;;  %s1388_s29 = sand.u32 (!%p1256_p8), 1, %s1166_s19  }
  0x60   : > { %s727_s17 = sshll.u32 (!%p1256_p8), %s1388_s29, 7  ;;  %s235_s7 = scalar_lea.sflag (!%p1256_p8), [#allocation3], %s1388_s29 }
  0x61   : > { %s1392_s6 = scalar_lea.vmem (!%p1256_p8), [#allocation2], %s727_s17  ;;  %p1501_p4 = scmp.ne.s32.totalorder (!%p1256_p8), %s1494_s24, 0 }
  0x66   : > { %1149 = dma.done.wait (%p1501_p4), %s235_s7, 2048  }
  0x67   : > { %1151 = vsyncadd (%p1501_p4), %s235_s7, 4294965248  ;;  %p1502_p5 = scmp.eq.s32.totalorder %s1237_s22, 0 }
  0x69   : > { %1153 = dma.done.wait (%p1502_p5), [#allocation6], 6144   ;;  %p1503_p8 = pmov %p1502_p5 }
  0x6a   : > { %v307_v0 = vld [vmem:[#allocation5 + $0x80] sm:$0xff]  ;;  %v308_v1 = vld [vmem:[#allocation5 + $0x88] sm:$0xff]  ;;  %v309_v5 = vld [vmem:[#allocation5 + $0x90] sm:$0xff]  ;;  %s730_s8 = sshll.u32 %s1388_s29, 6  ;;  %s740_s15 = sshll.u32 %s1237_s22, 10 }
  0x6b   : > { %1155 = vsyncadd (%p1503_p8), [#allocation6], 4294961152  ;;  %v291_v2 = vld [vmem:[#allocation5] sm:$0xff]  ;;  %v865_v3 = vpack.c.bf16 %v308_v1, %v307_v0  ;;  %v292_v4 = vld [vmem:[#allocation5 + $0x8] sm:$0xff]  ;;  %s272_s28 = scalar_lea.vmem [#allocation8], %s730_s8  ;;  %s1441_s12 = scalar_lea.hbm %s1490_s5, %s740_s15 }
  0x6c   : > { %v310_v6 = vld [vmem:[#allocation5 + $0x98] sm:$0xff]  ;;  %v867_v7 = vpack.c.bf16 %v292_v4, %v291_v2  ;;  %v293_v9 = vld [vmem:[#allocation5 + $0x10] sm:$0xff]  ;;  %v311_v11 = vld [vmem:[#allocation5 + $0xa0] sm:$0xff]  ;;  %s625_s30 = sshll.u32 %s272_s28, 4  ;;  %s612_s13 = scalar_lea.sflag [#allocation4], %s1388_s29  ;;  %s1436_s30 = int_to_ptr.vmem [resolvable:$true] %s625_s30 }
  0x6d   : > { %v869_v8 = vpack.c.bf16 %v310_v6, %v309_v5  ;;  %v294_v10 = vld [vmem:[#allocation5 + $0x18] sm:$0xff]  ;;  %866 = vmatprep.subr.bf16.mxu0 %v865_v3  ;;  %v312_v12 = vld [vmem:[#allocation5 + $0xa8] sm:$0xff]  ;;  %v295_v15 = vld [vmem:[#allocation5 + $0x20] sm:$0xff]  ;;  %s1104_s17 = scalar_lea.vmem %s1436_s30, 1024  ;;  %p1504_p0 = scmp.ne.s32.totalorder %s1499_s23, 0 }
  0x6e   : > { %868 = vmatpush3.bf16.msra.mxu0 %v867_v7  ;;  %v871_v13 = vpack.c.bf16 %v294_v10, %v293_v9  ;;  %v873_v14 = vpack.c.bf16 %v312_v12, %v311_v11  ;;  %v296_v16 = vld [vmem:[#allocation5 + $0x28] sm:$0xff]  ;;  %v313_v17 = vld [vmem:[#allocation5 + $0xb0] sm:$0xff]  ;;  %v314_v18 = vld [vmem:[#allocation5 + $0xb8] sm:$0xff]  ;;  %p1105_p11 = scmp.ne.s32.totalorder %s1436_s30, %s1104_s17  ;;  %s1183_s22 = smov [#allocation8]  }
  0x6f   : > { %870 = vmatprep.subr.bf16.mxu0 %v869_v8  ;;  %v875_v19 = vpack.c.bf16 %v296_v16, %v295_v15  ;;  %v877_v20 = vpack.c.bf16 %v314_v18, %v313_v17  ;;  %v297_v21 = vld [vmem:[#allocation5 + $0x30] sm:$0xff]  ;;  %v298_v22 = vld [vmem:[#allocation5 + $0x38] sm:$0xff]  ;;  %v315_v23 = vld [vmem:[#allocation5 + $0xc0] sm:$0xff]  ;;  %s1108_s7 = sshll.u32 %s1183_s22, 4  ;;  %s1109_s7 = int_to_ptr.vmem [resolvable:$false] %s1108_s7 }
  0x70   : > { %v316_v24 = vld [vmem:[#allocation5 + $0xc8] sm:$0xff]  ;;  %v879_v26 = vpack.c.bf16 %v298_v22, %v297_v21  ;;  %v299_v28 = vld [vmem:[#allocation5 + $0x40] sm:$0xff]  ;;  %v317_v30 = vld [vmem:[#allocation5 + $0xd0] sm:$0xff]  ;;  %p1106_p1 = pnand %p1105_p11, %p1504_p0  ;;  %p1111_p7 = scmp.lt.s32.totalorder %s1436_s30, %s1109_s7 }
  0x71   : > { %v276_v25 = vld [vmem:[%s1392_s6 + $0x8] sm:$0xff]  ;;  %v881_v27 = vpack.c.bf16 %v316_v24, %v315_v23  ;;  %v318_v31 = vld [vmem:[#allocation5 + $0xd8] sm:$0xff]  ;;  %v475_v33 = vld [vmem:[#allocation7] sm:$0xff] }
  0x72   : > { %872 = vmatpush3.bf16.msra.mxu0 %v871_v13  ;;  %394 = vmatprep.mubr.f32.mxu0 %v276_v25  ;;  %v300_v29 = vld [vmem:[#allocation5 + $0x48] sm:$0xff]  ;;  %v477_v35 = vld [vmem:[#allocation7 + $0x10] sm:$0xff]  ;;  %v885_v36 = vpack.c.bf16 %v318_v31, %v317_v30  ;;  %v302_v38 = vld [vmem:[#allocation5 + $0x58] sm:$0xff]  ;;  %p1107_p3 = pneg %p1106_p1 }
  0x73   : > { %874 = vmatprep.subr.bf16.mxu0 %v873_v14  ;;  %v883_v32 = vpack.c.bf16 %v300_v29, %v299_v28  ;;  %v476_v34 = vld [vmem:[#allocation7 + $0x8] sm:$0xff]  ;;  %v301_v37 = vld [vmem:[#allocation5 + $0x50] sm:$0xff]  ;;  %v478_v40 = vld [vmem:[#allocation7 + $0x18] sm:$0xff] }
  0x74   : > { %v897_v39 = vpack.c.bf16 %v476_v34, %v475_v33  ;;  %v319_v41 = vld [vmem:[#allocation5 + $0xe0] sm:$0xff]  ;;  %v320_v42 = vld [vmem:[#allocation5 + $0xe8] sm:$0xff]  ;;  %v901_v43 = vpack.c.bf16 %v478_v40, %v477_v35  ;;  %v887_v44 = vpack.c.bf16 %v302_v38, %v301_v37  ;;  %v321_v48 = vld [vmem:[#allocation5 + $0xf0] sm:$0xff] }
  0x75   : > { %v889_v45 = vpack.c.bf16 %v320_v42, %v319_v41  ;;  %v303_v46 = vld [vmem:[#allocation5 + $0x60] sm:$0xff]  ;;  %v304_v47 = vld [vmem:[#allocation5 + $0x68] sm:$0xff]  ;;  %v322_v49 = vld [vmem:[#allocation5 + $0xf8] sm:$0xff] }
  0x76   : > { %876 = vmatpush3.bf16.msra.mxu0 %v875_v19  ;;  %898 = vmatprep.subr.bf16.mxu1 %v897_v39  ;;  %v891_v50 = vpack.c.bf16 %v304_v47, %v303_v46  ;;  %v893_v51 = vpack.c.bf16 %v322_v49, %v321_v48  ;;  %v305_v52 = vld [vmem:[#allocation5 + $0x70] sm:$0xff]  ;;  %v306_v53 = vld [vmem:[#allocation5 + $0x78] sm:$0xff]  ;;  %v275_v55 = vld [vmem:[%s1392_s6] sm:$0xff] }
  0x77   : > { %878 = vmatprep.subr.bf16.mxu0 %v877_v20  ;;  %900 = vmatpush3.bf16.msra.mxu1 %v897_v39  ;;  %v895_v54 = vpack.c.bf16 %v306_v53, %v305_v52  ;;  %v278_v56 = vld [vmem:[%s1392_s6 + $0x18] sm:$0xff]  ;;  %v277_v57 = vld [vmem:[%s1392_s6 + $0x10] sm:$0xff]  ;;  %v280_v58 = vld [vmem:[%s1392_s6 + $0x28] sm:$0xff] }
  0x78   : > { %902 = vmatprep.subr.bf16.mxu1 %v901_v43  ;;  %v279_v59 = vld [vmem:[%s1392_s6 + $0x20] sm:$0xff]  ;;  %v282_v60 = vld [vmem:[%s1392_s6 + $0x38] sm:$0xff]  ;;  %v281_v61 = vld [vmem:[%s1392_s6 + $0x30] sm:$0xff] }
  0x79   : > { %v284_v62 = vld [vmem:[%s1392_s6 + $0x48] sm:$0xff]  ;;  %v283_v63 = vld [vmem:[%s1392_s6 + $0x40] sm:$0xff]  ;;  %v286_v0 = vld [vmem:[%s1392_s6 + $0x58] sm:$0xff] }
  0x7a   : > { %880 = vmatpush3.bf16.msra.mxu0 %v879_v26  ;;  %v285_v1 = vld [vmem:[%s1392_s6 + $0x50] sm:$0xff]  ;;  %v288_v2 = vld [vmem:[%s1392_s6 + $0x68] sm:$0xff]  ;;  %v287_v3 = vld [vmem:[%s1392_s6 + $0x60] sm:$0xff] }
  0x7b   : > { %882 = vmatprep.subr.bf16.mxu0 %v881_v27  ;;  %904 = vmatpush3.bf16.msra.mxu1 %v901_v43  ;;  %v290_v4 = vld [vmem:[%s1392_s6 + $0x78] sm:$0xff]  ;;  %v289_v5 = vld [vmem:[%s1392_s6 + $0x70] sm:$0xff]  ;;  %v479_v6 = vld [vmem:[#allocation7 + $0x20] sm:$0xff]  ;;  %s1110_s6 = scalar_lea.vmem %s1109_s7, 2048 }
  0x7c   : > { %v480_v7 = vld [vmem:[#allocation7 + $0x28] sm:$0xff]  ;;  %v481_v9 = vld [vmem:[#allocation7 + $0x30] sm:$0xff]  ;;  %v482_v10 = vld [vmem:[#allocation7 + $0x38] sm:$0xff]  ;;  %p1112_p9 = scmp.lt.s32.totalorder %s1110_s6, %s1104_s17 }
  0x7d   : > { %v905_v8 = vpack.c.bf16 %v480_v7, %v479_v6  ;;  %v909_v11 = vpack.c.bf16 %v482_v10, %v481_v9  ;;  %v483_v12 = vld [vmem:[#allocation7 + $0x40] sm:$0xff]  ;;  %v484_v13 = vld [vmem:[#allocation7 + $0x48] sm:$0xff]  ;;  %v485_v15 = vld [vmem:[#allocation7 + $0x50] sm:$0xff] }
  0x7e   : > { %884 = vmatpush3.bf16.msra.mxu0 %v883_v32  ;;  %v913_v14 = vpack.c.bf16 %v484_v13, %v483_v12  ;;  %v486_v16 = vld [vmem:[#allocation7 + $0x58] sm:$0xff]  ;;  %v487_v18 = vld [vmem:[#allocation7 + $0x60] sm:$0xff]  ;;  %v488_v19 = vld [vmem:[#allocation7 + $0x68] sm:$0xff]  ;;  %p1113_p12 = por %p1112_p9, %p1111_p7 }
  0x7f   : > { %886 = vmatprep.subr.bf16.mxu0 %v885_v36  ;;  %906 = vmatprep.subr.bf16.mxu1 %v905_v8  ;;  %v917_v17 = vpack.c.bf16 %v486_v16, %v485_v15  ;;  %v921_v20 = vpack.c.bf16 %v488_v19, %v487_v18  ;;  %v489_v21 = vld [vmem:[#allocation7 + $0x70] sm:$0xff]  ;;  %v490_v22 = vld [vmem:[#allocation7 + $0x78] sm:$0xff]  ;;  %v1421_v25 = vld [vmem:[%s1487_s2] ss:$0 sm:$0xff] }
  0x80   : > { %908 = vmatpush3.bf16.msra.mxu1 %v905_v8  ;;  %v925_v23 = vpack.c.bf16 %v490_v22, %v489_v21  ;;  %p1114_p2 = pnand %p1113_p12, %p1107_p3 }
  0x81   : > { %910 = vmatprep.subr.bf16.mxu1 %v909_v11 }
  0x82   : > { %888 = vmatpush3.bf16.msra.mxu0 %v887_v44 }
  0x83   : > { %890 = vmatprep.subr.bf16.mxu0 %v889_v45 }
  0x84   : > { %912 = vmatpush3.bf16.msra.mxu1 %v909_v11 }
  0x85   : > { %914 = vmatprep.subr.bf16.mxu1 %v913_v14 }
  0x86   : > { %892 = vmatpush3.bf16.msra.mxu0 %v891_v50 }
  0x87   : > { %894 = vmatprep.subr.bf16.mxu0 %v893_v51 }
  0x88   : > { %916 = vmatpush3.bf16.msra.mxu1 %v913_v14 }
  0x89   : > { %918 = vmatprep.subr.bf16.mxu1 %v917_v17 }
  0x8a   : > { %896 = vmatpush3.bf16.msra.mxu0 %v895_v54 }
  0x8c   : > { %920 = vmatpush3.bf16.msra.mxu1 %v917_v17 }
  0x8d   : > { %395 = vmatmul.mubr.f32.vlgmr.msra.gmra.mrb[0].mxu0 %v275_v55  ;;  %922 = vmatprep.subr.bf16.mxu1 %v921_v20 }
  0x8e   : > { %399 = vmatprep.mubr.f32.mxu0 %v278_v56 }
  0x90   : > { %924 = vmatpush3.bf16.msra.mxu1 %v921_v20 }
  0x91   : > { %400 = vmatmul.mubr.f32.gmra.mrb[2].mxu0 %v277_v57  ;;  %926 = vmatprep.subr.bf16.mxu1 %v925_v23 }
  0x92   : > { %404 = vmatprep.mubr.f32.mxu0 %v280_v58 }
  0x94   : > { %928 = vmatpush3.bf16.msra.mxu1 %v925_v23 }
  0x95   : > { %405 = vmatmul.mubr.f32.gmra.mrb[4].mxu0 %v279_v59 }
  0x96   : > { %409 = vmatprep.mubr.f32.mxu0 %v282_v60 }
  0x99   : > { %410 = vmatmul.mubr.f32.gmra.mrb[6].mxu0 %v281_v61 }
  0x9a   : > { %414 = vmatprep.mubr.f32.mxu0 %v284_v62 }
  0x9d   : > { %415 = vmatmul.mubr.f32.gmra.mrb[8].mxu0 %v283_v63 }
  0x9e   : > { %419 = vmatprep.mubr.f32.mxu0 %v286_v0 }
  0xa1   : > { %420 = vmatmul.mubr.f32.gmra.mrb[10].mxu0 %v285_v1 }
  0xa2   : > { %424 = vmatprep.mubr.f32.mxu0 %v288_v2 }
  0xa5   : > { %425 = vmatmul.mubr.f32.gmra.mrb[12].mxu0 %v287_v3 }
  0xa6   : > { %429 = vmatprep.mubr.f32.mxu0 %v290_v4 }
  0xa9   : > { %430 = vmatmul.mubr.f32.gmra.mrb[14].mxu0 %v289_v5 }
 0x160   : > { %v773_v24 = vpop.f32.mrb[0].mxu0 }
 0x161   : > { %v774_v26 = vpop.f32.mrb[1].mxu0 }
 0x162   : > { %v775_v27 = vadd.f32 %v774_v26, %v773_v24 }
 0x164   : > { %v397_v28 = vadd.f32 %v775_v27, %v1421_v25  ;;  %v776_v29 = vpop.f32.mrb[2].mxu0 }
 0x165   : > { %v777_v30 = vpop.f32.mrb[3].mxu0 }
 0x166   : > { %v443_v31 = vmul.f32 0.70710677, %v397_v28  ;;  %v778_v32 = vadd.f32 %v777_v30, %v776_v29  ;;  %v435_v49 = vmul.f32 0.5, %v397_v28 }
 0x168   : > { %v402_v33 = vadd.f32 %v778_v32, %v1421_v25  ;;  %v779_v34 = vpop.f32.mrb[4].mxu0  ;;  %1002 = verf.f32 %v443_v31 }
 0x169   : > { %v780_v35 = vpop.f32.mrb[5].mxu0 }
 0x16a   : > { %v444_v36 = vmul.f32 0.70710677, %v402_v33  ;;  %v781_v37 = vadd.f32 %v780_v35, %v779_v34  ;;  %v436_v58 = vmul.f32 0.5, %v402_v33  ;;  %v732_v33 = vld [vmem:[%s1489_s4] ss:$0 sm:$0xff] }
 0x16c   : > { %1004 = verf.f32 %v444_v36  ;;  %v407_v38 = vadd.f32 %v781_v37, %v1421_v25  ;;  %v782_v39 = vpop.f32.mrb[6].mxu0 }
 0x16d   : > { %v783_v40 = vpop.f32.mrb[7].mxu0 }
 0x16e   : > { %v445_v41 = vmul.f32 0.70710677, %v407_v38  ;;  %v784_v42 = vadd.f32 %v783_v40, %v782_v39  ;;  %v437_v3 = vmul.f32 0.5, %v407_v38 }
 0x170   : > { %1006 = verf.f32 %v445_v41  ;;  %v412_v43 = vadd.f32 %v784_v42, %v1421_v25  ;;  %v785_v44 = vpop.f32.mrb[8].mxu0 }
 0x171   : > { %v786_v45 = vpop.f32.mrb[9].mxu0 }
 0x172   : > { %v1003_v46 = vpop.eup %1002  ;;  %v446_v47 = vmul.f32 0.70710677, %v412_v43  ;;  %v787_v48 = vadd.f32 %v786_v45, %v785_v44  ;;  %v438_v12 = vmul.f32 0.5, %v412_v43 }
 0x173   : > { %v459_v50 = vadd.f32 1.0, %v1003_v46 }
 0x174   : > { %1008 = verf.f32 %v446_v47  ;;  %v417_v51 = vadd.f32 %v787_v48, %v1421_v25  ;;  %v788_v52 = vpop.f32.mrb[10].mxu0 }
 0x175   : > { %v789_v53 = vpop.f32.mrb[11].mxu0  ;;  %v467_v54 = vmul.f32 %v459_v50, %v435_v49 }
 0x176   : > { %v1005_v55 = vpop.eup %1004  ;;  %v447_v56 = vmul.f32 0.70710677, %v417_v51  ;;  %v790_v57 = vadd.f32 %v789_v53, %v788_v52  ;;  %v439_v18 = vmul.f32 0.5, %v417_v51 }
 0x177   : > { %853 = vmatprep.mubr.f32.mxu1 %v467_v54  ;;  %v460_v59 = vadd.f32 1.0, %v1005_v55 }
 0x178   : > { %1010 = verf.f32 %v447_v56  ;;  %v422_v60 = vadd.f32 %v790_v57, %v1421_v25  ;;  %v791_v61 = vpop.f32.mrb[12].mxu0 }
 0x179   : > { %v792_v62 = vpop.f32.mrb[13].mxu0  ;;  %v468_v63 = vmul.f32 %v460_v59, %v436_v58 }
 0x17a   : > { %v1007_v0 = vpop.eup %1006  ;;  %v448_v1 = vmul.f32 0.70710677, %v422_v60  ;;  %v793_v2 = vadd.f32 %v792_v62, %v791_v61  ;;  %v440_v22 = vmul.f32 0.5, %v422_v60 }
 0x17b   : > { %854 = vmatmul.mubr.f32.vlgmr.msra.gmra.mrb[0].mxu1 %v468_v63  ;;  %v461_v4 = vadd.f32 1.0, %v1007_v0 }
 0x17c   : > { %1012 = verf.f32 %v448_v1  ;;  %v427_v5 = vadd.f32 %v793_v2, %v1421_v25  ;;  %v794_v6 = vpop.f32.mrb[14].mxu0 }
 0x17d   : > { %v795_v7 = vpop.f32.mrb[15].mxu0  ;;  %v469_v8 = vmul.f32 %v461_v4, %v437_v3 }
 0x17e   : > { %v1009_v9 = vpop.eup %1008  ;;  %v449_v10 = vmul.f32 0.70710677, %v427_v5  ;;  %v796_v11 = vadd.f32 %v795_v7, %v794_v6  ;;  %v441_v27 = vmul.f32 0.5, %v427_v5 }
 0x17f   : > { %856 = vmatprep.mubr.f32.mxu1 %v469_v8  ;;  %v462_v13 = vadd.f32 1.0, %v1009_v9 }
 0x180   : > { %1014 = verf.f32 %v449_v10  ;;  %v432_v14 = vadd.f32 %v796_v11, %v1421_v25 }
 0x181   : > { %v470_v15 = vmul.f32 %v462_v13, %v438_v12 }
 0x182   : > { %v1011_v16 = vpop.eup %1010  ;;  %v450_v17 = vmul.f32 0.70710677, %v432_v14  ;;  %v442_v30 = vmul.f32 0.5, %v432_v14 }
 0x183   : > { %857 = vmatmul.mubr.f32.gmra.mrb[2].mxu1 %v470_v15  ;;  %v463_v19 = vadd.f32 1.0, %v1011_v16 }
 0x184   : > { %1016 = verf.f32 %v450_v17 }
 0x185   : > { %v471_v20 = vmul.f32 %v463_v19, %v439_v18 }
 0x186   : > { %v1013_v21 = vpop.eup %1012 }
 0x187   : > { %859 = vmatprep.mubr.f32.mxu1 %v471_v20  ;;  %v464_v23 = vadd.f32 1.0, %v1013_v21 }
 0x189   : > { %v472_v24 = vmul.f32 %v464_v23, %v440_v22 }
 0x18a   : > { %v1015_v26 = vpop.eup %1014 }
 0x18b   : > { %860 = vmatmul.mubr.f32.gmra.mrb[4].mxu1 %v472_v24  ;;  %v465_v28 = vadd.f32 1.0, %v1015_v26 }
 0x18d   : > { %v473_v29 = vmul.f32 %v465_v28, %v441_v27 }
 0x18e   : > { %v1017_v25 = vpop.eup %1016 }
 0x18f   : > { %862 = vmatprep.mubr.f32.mxu1 %v473_v29  ;;  %v466_v31 = vadd.f32 1.0, %v1017_v25 }
 0x191   : > { %v474_v32 = vmul.f32 %v466_v31, %v442_v30 }
 0x193   : > { %863 = vmatmul.mubr.f32.gmra.mrb[6].mxu1 %v474_v32 }
 0x24e   : > { %v855_v34 = vpop.f32.mrb[0].mxu1 }
 0x24f   : > { %v570_v35 = vadd.f32 %v855_v34, %v732_v33  ;;  %v564_v36 = vpop.f32.mrb[1].mxu1 }
 0x250   : > { %v565_v37 = vadd.f32 %v732_v33, %v564_v36 }
 0x251   : > { %604 = vst [vmem:[%s272_s28 + $0x8] sm:$0xff] %v570_v35 }
 0x252   : > { %603 = vst [vmem:[%s272_s28] sm:$0xff] %v565_v37 }
 0x256   : > { %v858_v38 = vpop.f32.mrb[2].mxu1 }
 0x257   : > { %v580_v39 = vadd.f32 %v858_v38, %v732_v33  ;;  %v574_v40 = vpop.f32.mrb[3].mxu1 }
 0x258   : > { %v575_v41 = vadd.f32 %v732_v33, %v574_v40 }
 0x259   : > { %606 = vst [vmem:[%s272_s28 + $0x18] sm:$0xff] %v580_v39 }
 0x25a   : > { %605 = vst [vmem:[%s272_s28 + $0x10] sm:$0xff] %v575_v41 }
 0x25e   : > { %v861_v42 = vpop.f32.mrb[4].mxu1 }
 0x25f   : > { %v590_v43 = vadd.f32 %v861_v42, %v732_v33  ;;  %v584_v44 = vpop.f32.mrb[5].mxu1 }
 0x260   : > { %v585_v45 = vadd.f32 %v732_v33, %v584_v44 }
 0x261   : > { %608 = vst [vmem:[%s272_s28 + $0x28] sm:$0xff] %v590_v43 }
 0x262   : > { %607 = vst [vmem:[%s272_s28 + $0x20] sm:$0xff] %v585_v45 }
 0x266   : > { %v864_v46 = vpop.f32.mrb[6].mxu1 }
 0x267   : > { %v600_v47 = vadd.f32 %v864_v46, %v732_v33  ;;  %v594_v48 = vpop.f32.mrb[7].mxu1 }
 0x268   : > { %v595_v49 = vadd.f32 %v732_v33, %v594_v48 }
 0x269   : > { %610 = vst [vmem:[%s272_s28 + $0x38] sm:$0xff] %v600_v47 }
 0x26a   : > { %609 = vst [vmem:[%s272_s28 + $0x30] sm:$0xff] %v595_v49 }
 0x26b   : > { %1117 = shalt.err (!%p1114_p2)
}
 0x26c   : > { %s1118_s24 = scalar_lea.hbm %s1441_s12, 1024  ;;  %s1122_s10 = scalar_lea.hbm %s1490_s5, 2048 }
 0x26d   : > { %p1119_p13 = scmp.ne.s32.totalorder %s1441_s12, %s1118_s24  ;;  %p1123_p4 = scmp.lt.u32.totalorder %s1441_s12, %s1490_s5 }
 0x26e   : > { %p1124_p5 = scmp.lt.u32.totalorder %s1122_s10, %s1118_s24  ;;  %p1126_p11 = scmp.lt.u32.totalorder %s1118_s24, %s1441_s12 }
 0x26f   : > { %p1120_p6 = pnand %p1119_p13, %p1504_p0 }
 0x270   : > { %p1125_p8 = por %p1124_p5, %p1123_p4 }
 0x271   : > { %p1121_p10 = pneg %p1120_p6 }
 0x272   : > { %p1127_p1 = por %p1126_p11, %p1125_p8 }
 0x274   : > { %p1128_p3 = pnand %p1127_p1, %p1121_p10 }
 0x276   : > { %1131 = shalt.err (!%p1128_p3)
}
 0x277   : > { %s1184_s15 = smov 128   ;;  %s1185_s16 = smov 8  }
 0x278   : > { %939 = dma.vmem_to_hbm [thread:$0]  (%p1504_p0), %s1436_s30, 1024, %s1441_s12, %s612_s13, %s1184_s15, %s1184_s15, %s1185_s16  }
 0x279 PF: > { %s640_s9 = sand.u32 1, %s1162_s18   ;;  %p1505_p7 = scmp.ne.s32.totalorder %s1495_s25, 0 }
 0x27a   : > { %p1506_p9 = scmp.ge.s32.totalorder %s1174_s21, 2  ;;  %s641_s17 = scalar_lea.sflag [#allocation4], %s640_s9 }
 0x27c   : > { %p953_p12 = pnand %p1506_p9, %p1505_p7 }
 0x27e   : > { %1157 = dma.done.wait (!%p953_p12), %s641_s17, 1024  }
 0x27f   : > { %1159 = vsyncadd (!%p953_p12), %s641_s17, 4294966272  ;;  %p19_p2 = scmp.ge.s32.totalorder %s1326_s14, 4   ;;  %s1507_s18 = smov %s1166_s19 }
 0x280   : > { %s1508_s19 = smov %s1170_s20  ;;  %s1509_s20 = smov %s1342_s27 }
 0x281   : > { %s1510_s21 = smov %s1326_s14  ;;  %21 = sbr.rel (!%p19_p2) target bundleno = 6 (0x6), region = 93 }
 0x288   :  { %646 = vsyncpa [#allocation3], 1 }
 0x289   :  { %648 = vsyncpa [#allocation3 + $0x1], 1 }
 0x28a   :  { %649 = vsyncpa [#allocation6], 1 }
 0x28b   :  { %650 = vsyncpa [#allocation4], 1 }
 0x28c   :  { %652 = vsyncpa [#allocation4 + $0x1], 1 }

</bundles_post_ra>
